<compile_context>
chip_gen: v7x
topology: tpu7x:2x2x1
jax: 0.10.0
libtpu: 0.0.40
codegen_flags: <defaults>
</compile_context>

<pallas_src>
import jax
import jax.numpy as jnp
from jax.experimental import pallas as pl
from jax.experimental.pallas import tpu as pltpu


LANE = 128          # vreg lane width; layer-2 channels are zero-padded to this
NEG_INF = -1e30     # additive softmax mask value for non-edges


# ----------------------- shared GATv2 layer math ---------------------------- #
def gatv2_layer_math(x, mask_bias, w, b, e_proj, att_row, bias, *, in_kernel):
    """One GATv2Conv layer (heads=1) on a dense graph.

    Shared by the Pallas kernel body (in_kernel=True) and the pure-JAX reference
    (in_kernel=False); they differ only in accumulation order / approx reciprocal.

    x         : [N, Din]   f32 node features
    mask_bias : [N, N]     f32 additive mask, 0 for edge s->t (incl. self loop), -1e30 otherwise
    w         : [Din, 2C]  bf16, concat(lin_l.weight, lin_r.weight), each half a 128-lane multiple
    b         : [1, 2C]    f32, concat(lin_l.bias, lin_r.bias)
    e_proj    : [N, N, C]  bf16, lin_edge(edge_attr) densified (self loops = per-target mean)
    att_row   : [1, C]     f32 attention vector
    bias      : [1, C]     f32 output bias
    """
    c = att_row.shape[-1]

    # fused lin_l | lin_r: one lane-dense MXU matmul (bf16 operands, f32 acc);
    # both halves are 128-lane multiples so the split lands on a vreg boundary.
    xw = jnp.dot(x.astype(jnp.bfloat16), w,
                 preferred_element_type=jnp.float32) + b              # [N, 2C]
    x_l = xw[:, :c]                                                    # source transform
    x_r = xw[:, c:]                                                    # target transform

    # GATv2 logits: leaky_relu(x_r[t] + x_l[s] + e[t, s]) . att   (f32 on VPU)
    m = x_r[:, None, :] + x_l[None, :, :] + e_proj.astype(jnp.float32)  # [Nt, Ns, C]
    z = jnp.where(m > 0, m, jnp.float32(0.2) * m)                       # leaky_relu(0.2)

    # f32 attention reduction (VPU multiply + lane reduce): keeps the natural
    # [Nt, Ns] layout (no [N*N, 1] MXU result + relayout) and avoids bf16 logits.
    score = jnp.sum(z * att_row.reshape(1, 1, c), axis=-1)              # [Nt, Ns]

    # masked softmax over incoming edges (source axis, per target) via the
    # precomputed additive mask.  Self loop guarantees a finite row max, so masked
    # entries underflow to exactly 0 after exp() and the denominator is >= 1.
    score = score + mask_bias
    score = score - jnp.max(score, axis=-1, keepdims=True)
    p = jnp.exp(score)
    denom = jnp.sum(p, axis=-1, keepdims=True)
    inv = pl.reciprocal(denom, approx=True) if in_kernel else 1.0 / denom
    alpha = p * inv                                                     # [Nt, Ns]

    # aggregate messages on the MXU: out[t] = sum_s alpha[t, s] * x_l[s]
    out = jnp.dot(alpha.astype(jnp.bfloat16), x_l.astype(jnp.bfloat16),
                  preferred_element_type=jnp.float32) + bias            # [N, C]
    return out


# ----------------------------- Pallas kernel -------------------------------- #
def _gnn_fused_kernel(x_ref, mask_ref, e1_ref, e2_ref,
                      w1_ref, b1_ref, att1_ref, bias1_ref,
                      w2_ref, b2_ref, att2_ref, bias2_ref,
                      out_ref):
    """One graph per grid step: c1 (GATv2) -> c2 (GATv2) -> mean over nodes."""
    mask_bias = mask_ref[...]
    h = gatv2_layer_math(x_ref[...], mask_bias, w1_ref[...], b1_ref[...],
                         e1_ref[...], att1_ref[...], bias1_ref[...], in_kernel=True)
    out = gatv2_layer_math(h, mask_bias, w2_ref[...], b2_ref[...],
                           e2_ref[...], att2_ref[...], bias2_ref[...], in_kernel=True)
    out_ref[...] = jnp.mean(out, axis=0, keepdims=True)                 # final x.mean(0)


def gnn_fused_batched(x, mask_bias, e1, e2,
                      w1, b1, att1, bias1, w2, b2, att2, bias2, *, out_dim):
    bsz, n, din = x.shape
    c1 = att1.shape[-1]
    c2p = att2.shape[-1]

    def full(a):  # whole array, constant block index -> stays VMEM-resident
        return pl.BlockSpec(a.shape, lambda b, _nd=a.ndim: (0,) * _nd)

    grid_spec = pltpu.PrefetchScalarGridSpec(
        num_scalar_prefetch=0,
        grid=(bsz,),
        in_specs=[
            pl.BlockSpec((None, n, din), lambda b: (b, 0, 0)),         # x
            pl.BlockSpec((None, n, n), lambda b: (b, 0, 0)),           # mask bias
            pl.BlockSpec((None, n, n, c1), lambda b: (b, 0, 0, 0)),    # e1 (bf16)
            pl.BlockSpec((None, n, n, c2p), lambda b: (b, 0, 0, 0)),   # e2 (bf16, padded)
            full(w1), full(b1), full(att1), full(bias1),
            full(w2), full(b2), full(att2), full(bias2),
        ],
        out_specs=pl.BlockSpec((None, 1, c2p), lambda b: (b, 0, 0)),
    )
    out = pl.pallas_call(
        _gnn_fused_kernel,
        out_shape=jax.ShapeDtypeStruct((bsz, 1, c2p), jnp.float32),
        grid_spec=grid_spec,
        compiler_params=pltpu.CompilerParams(
            dimension_semantics=("parallel",),           # shards graphs across v7x's 2 TCs
            vmem_limit_bytes=32 * 1024 * 1024),
    )(x, mask_bias, e1, e2, w1, b1, att1, bias1, w2, b2, att2, bias2)
    return out[:, 0, :out_dim]                           # drop the zero pad lanes


# ------------------------------- glue (JAX) ---------------------------------- #
def glorot(key, shape):
    fan_in, fan_out = shape[0], shape[-1]
    s = jnp.sqrt(6.0 / (fan_in + fan_out))
    return jax.random.uniform(key, shape, jnp.float32, -s, s)


def init_gatv2_params(key, in_dim, out_dim, edge_dim):
    ks = jax.random.split(key, 7)
    wl = glorot(ks[0], (in_dim, out_dim))        # lin_l.weight (transposed)
    bl = glorot(ks[1], (1, out_dim)) * 0.1       # lin_l.bias
    wr = glorot(ks[2], (in_dim, out_dim))        # lin_r.weight
    br = glorot(ks[3], (1, out_dim)) * 0.1       # lin_r.bias
    we = glorot(ks[4], (edge_dim, out_dim))      # lin_edge.weight (no bias)
    att = glorot(ks[5], (1, out_dim))            # att
    bias = glorot(ks[6], (1, out_dim)) * 0.1     # output bias
    return (wl, bl, wr, br, we, att, bias)


def _round_up_lanes(c):
    return max(LANE, ((c + LANE - 1) // LANE) * LANE)


def _pad_lanes(a, c_pad):
    pad = c_pad - a.shape[-1]
    if pad == 0:
        return a
    return jnp.pad(a, [(0, 0)] * (a.ndim - 1) + [(0, pad)])


def pack_layer_weights(params, c_pad):
    """Pack lin_l|lin_r into one [Din, 2*c_pad] bf16 weight; each half is zero-padded
    to a 128-lane multiple so the in-kernel split lands on a vreg boundary."""
    wl, bl, wr, br, we, att, bias = params
    w = jnp.concatenate([_pad_lanes(wl, c_pad), _pad_lanes(wr, c_pad)],
                        axis=1).astype(jnp.bfloat16)                    # [Din, 2*c_pad]
    b = jnp.concatenate([_pad_lanes(bl, c_pad), _pad_lanes(br, c_pad)], axis=1)
    att_row = _pad_lanes(att, c_pad)                                     # [1, c_pad] f32
    bias_p = _pad_lanes(bias, c_pad)                                     # [1, c_pad] f32
    return w, b, att_row, bias_p


def pack_weights(params1, params2):
    w1, b1, att1, bias1 = pack_layer_weights(params1, _round_up_lanes(params1[0].shape[1]))
    w2, b2, att2, bias2 = pack_layer_weights(params2, _round_up_lanes(params2[0].shape[1]))
    return (w1, b1, att1, bias1, w2, b2, att2, bias2)


def densify_mask_bias(edge_index, num_nodes):
    """Edge list -> additive softmax mask: 0 where edge s->t (or self loop) exists,
    -1e30 otherwise.  Assumes no duplicate (src, dst) pairs and no explicit self
    loops (PyG softmaxes duplicated edges separately, which would diverge)."""
    src, dst = edge_index[0], edge_index[1]
    adj = jnp.zeros((num_nodes, num_nodes), jnp.float32).at[dst, src].set(1.0)
    diag = jnp.arange(num_nodes)
    adj = adj.at[diag, diag].set(1.0)
    return jnp.where(adj > 0, 0.0, NEG_INF).astype(jnp.float32)


def densify_edge_proj(edge_index, edge_attr, we, num_nodes):
    """Project edge attrs with lin_edge ([E, edge_dim] @ [edge_dim, C]) and densify
    to [N, N, C].  Self-loop rows get the per-target-node mean of incoming projected
    edge attrs (PyG add_self_loops fill_value='mean'; mean commutes with the linear
    projection).  Keeping this in glue keeps the degenerate K=4 contraction off the MXU."""
    src, dst = edge_index[0], edge_index[1]
    c = we.shape[1]
    ep = edge_attr @ we                                                  # [E, C]
    deg = jnp.zeros((num_nodes,), jnp.float32).at[dst].add(1.0)
    loop = (jnp.zeros((num_nodes, c), jnp.float32).at[dst].add(ep)
            / jnp.maximum(deg, 1.0)[:, None])                            # per-target mean
    dense = jnp.zeros((num_nodes, num_nodes, c), jnp.float32).at[dst, src].set(ep)
    diag = jnp.arange(num_nodes)
    return dense.at[diag, diag].set(loop)


def prepare_graph(params1, params2, x, edge_index, edge_attr):
    """Per-graph kernel operands: node features, additive mask, and the dense bf16
    edge projections for both layers (layer 2 zero-padded to 128 lanes)."""
    n = x.shape[0]
    c2_pad = _round_up_lanes(params2[0].shape[1])
    mask_bias = densify_mask_bias(edge_index, n)
    e1 = densify_edge_proj(edge_index, edge_attr, params1[4], n).astype(jnp.bfloat16)
    e2 = _pad_lanes(densify_edge_proj(edge_index, edge_attr, params2[4], n),
                    c2_pad).astype(jnp.bfloat16)
    return x, mask_bias, e1, e2


def gnn_forward_batched(params1, params2, x, edge_index, edge_attr):
    """Batched forward: x [B,N,Din], edge_index [B,2,E], edge_attr [B,E,De] -> [B,out_dim].
    Each graph is the original GNN.forward(x, edge_index, edge_attr)."""
    out_dim = params2[0].shape[1]
    weights = pack_weights(params1, params2)
    xg, mask, e1, e2 = jax.vmap(
        lambda xi, ei, ea: prepare_graph(params1, params2, xi, ei, ea)
    )(x, edge_index, edge_attr)
    return gnn_fused_batched(xg, mask, e1, e2, *weights, out_dim=out_dim)


def gnn_forward(params1, params2, x, edge_index, edge_attr):
    """Single-graph forward matching the PyTorch module."""
    return gnn_forward_batched(params1, params2, x[None], edge_index[None],
                               edge_attr[None])[0]


# --------------------------- pure-JAX reference ------------------------------ #
def gnn_forward_ref(params1, params2, x, edge_index, edge_attr):
    out_dim = params2[0].shape[1]
    w1, b1, att1, bias1, w2, b2, att2, bias2 = pack_weights(params1, params2)
    xg, mask_bias, e1, e2 = prepare_graph(params1, params2, x, edge_index, edge_attr)
    h = gatv2_layer_math(xg, mask_bias, w1, b1, e1, att1, bias1, in_kernel=False)
    out = gatv2_layer_math(h, mask_bias, w2, b2, e2, att2, bias2, in_kernel=False)
    return jnp.mean(out, axis=0)[:out_dim]


# ---------------------------------- main ------------------------------------- #
if __name__ == "__main__":
    node_dim, edge_dim, hidden, out_dim = 16, 4, 256, 32   # c1 hidden is 256 per module
    num_nodes, batch = 8, 4

    key = jax.random.PRNGKey(0)
    k_x, k_e, k_p1, k_p2 = jax.random.split(key, 4)

    x = jax.random.normal(k_x, (batch, num_nodes, node_dim), jnp.float32)

    # bidirectional ring graph, no explicit self loops (GATv2Conv adds them itself)
    s = jnp.arange(num_nodes)
    d = (s + 1) % num_nodes
    ei = jnp.stack([jnp.concatenate([s, d]), jnp.concatenate([d, s])], axis=0)  # [2, E], E=16
    edge_index = jnp.broadcast_to(ei, (batch,) + ei.shape)
    edge_attr = jax.random.normal(k_e, (batch, ei.shape[1], edge_dim), jnp.float32)

    params1 = init_gatv2_params(k_p1, node_dim, hidden, edge_dim)
    params2 = init_gatv2_params(k_p2, hidden, out_dim, edge_dim)

    out = gnn_forward_batched(params1, params2, x, edge_index, edge_attr)
    out = jax.block_until_ready(out)

    out_ref = jax.vmap(
        lambda xi, ei_, ea: gnn_forward_ref(params1, params2, xi, ei_, ea)
    )(x, edge_index, edge_attr)

    assert out.shape == (batch, out_dim)
    assert jnp.allclose(out, out_ref, atol=5e-3, rtol=5e-3), (out, out_ref)

    print("KERNEL_OK")
</pallas_src>

<mosaic_0001>
module attributes {stable_mosaic.version = 11 : i64} {
  func.func @_gnn_fused_kernel(%arg0: i32, %arg1: memref<1x8x16xf32, #tpu.memory_space<vmem>>, %arg2: memref<1x8x8xf32, #tpu.memory_space<vmem>>, %arg3: memref<1x8x8x256xbf16, #tpu.memory_space<vmem>>, %arg4: memref<1x8x8x128xbf16, #tpu.memory_space<vmem>>, %arg5: memref<16x512xbf16, #tpu.memory_space<vmem>>, %arg6: memref<1x512xf32, #tpu.memory_space<vmem>>, %arg7: memref<1x256xf32, #tpu.memory_space<vmem>>, %arg8: memref<1x256xf32, #tpu.memory_space<vmem>>, %arg9: memref<256x256xbf16, #tpu.memory_space<vmem>>, %arg10: memref<1x256xf32, #tpu.memory_space<vmem>>, %arg11: memref<1x128xf32, #tpu.memory_space<vmem>>, %arg12: memref<1x128xf32, #tpu.memory_space<vmem>>, %arg13: memref<1x1x128xf32, #tpu.memory_space<vmem>>) attributes {dimension_semantics = [#tpu.dimension_semantics<parallel>], iteration_bounds = array<i64: 4>, scalar_prefetch = 0 : i64, scratch_operands = 0 : i64, tpu.core_type = #tpu.core_type<tc>, window_params = [{transform_indices = @transform_0, window_bounds = array<i64: 1, 8, 16>}, {transform_indices = @transform_1, window_bounds = array<i64: 1, 8, 8>}, {transform_indices = @transform_2, window_bounds = array<i64: 1, 8, 8, 256>}, {transform_indices = @transform_3, window_bounds = array<i64: 1, 8, 8, 128>}, {pipeline_mode = #tpu.pipeline_mode<synchronous>, transform_indices = @transform_4, window_bounds = array<i64: 16, 512>}, {pipeline_mode = #tpu.pipeline_mode<synchronous>, transform_indices = @transform_5, window_bounds = array<i64: 1, 512>}, {pipeline_mode = #tpu.pipeline_mode<synchronous>, transform_indices = @transform_6, window_bounds = array<i64: 1, 256>}, {pipeline_mode = #tpu.pipeline_mode<synchronous>, transform_indices = @transform_7, window_bounds = array<i64: 1, 256>}, {pipeline_mode = #tpu.pipeline_mode<synchronous>, transform_indices = @transform_8, window_bounds = array<i64: 256, 256>}, {pipeline_mode = #tpu.pipeline_mode<synchronous>, transform_indices = @transform_9, window_bounds = array<i64: 1, 256>}, {pipeline_mode = #tpu.pipeline_mode<synchronous>, transform_indices = @transform_10, window_bounds = array<i64: 1, 128>}, {pipeline_mode = #tpu.pipeline_mode<synchronous>, transform_indices = @transform_11, window_bounds = array<i64: 1, 128>}, {transform_indices = @transform_12, window_bounds = array<i64: 1, 1, 128>}]} {
    %c0 = arith.constant 0 : index
    %c0_0 = arith.constant 0 : index
    %c0_1 = arith.constant 0 : index
    %0 = vector.load %arg2[%c0, %c0_0, %c0_1] : memref<1x8x8xf32, #tpu.memory_space<vmem>>, vector<1x8x8xf32>
    %1 = vector.shape_cast %0 : vector<1x8x8xf32> to vector<8x8xf32>
    %c0_2 = arith.constant 0 : index
    %c0_3 = arith.constant 0 : index
    %c0_4 = arith.constant 0 : index
    %2 = vector.load %arg1[%c0_2, %c0_3, %c0_4] : memref<1x8x16xf32, #tpu.memory_space<vmem>>, vector<1x8x16xf32>
    %3 = vector.shape_cast %2 : vector<1x8x16xf32> to vector<8x16xf32>
    %c0_5 = arith.constant 0 : index
    %c0_6 = arith.constant 0 : index
    %4 = vector.load %arg5[%c0_5, %c0_6] : memref<16x512xbf16, #tpu.memory_space<vmem>>, vector<16x512xbf16>
    %c0_7 = arith.constant 0 : index
    %c0_8 = arith.constant 0 : index
    %5 = vector.load %arg6[%c0_7, %c0_8] : memref<1x512xf32, #tpu.memory_space<vmem>>, vector<1x512xf32>
    %c0_9 = arith.constant 0 : index
    %c0_10 = arith.constant 0 : index
    %c0_11 = arith.constant 0 : index
    %c0_12 = arith.constant 0 : index
    %6 = vector.load %arg3[%c0_9, %c0_10, %c0_11, %c0_12] : memref<1x8x8x256xbf16, #tpu.memory_space<vmem>>, vector<1x8x8x256xbf16>
    %7 = vector.shape_cast %6 : vector<1x8x8x256xbf16> to vector<8x8x256xbf16>
    %c0_13 = arith.constant 0 : index
    %c0_14 = arith.constant 0 : index
    %8 = vector.load %arg7[%c0_13, %c0_14] : memref<1x256xf32, #tpu.memory_space<vmem>>, vector<1x256xf32>
    %c0_15 = arith.constant 0 : index
    %c0_16 = arith.constant 0 : index
    %9 = vector.load %arg8[%c0_15, %c0_16] : memref<1x256xf32, #tpu.memory_space<vmem>>, vector<1x256xf32>
    %10 = arith.truncf %3 : vector<8x16xf32> to vector<8x16xbf16>
    %cst = arith.constant dense<0.000000e+00> : vector<8x512xf32>
    %11 = tpu.matmul %10, %4, %cst {dimension_numbers = #tpu.dot_dimension_numbers<[1], [0], [0], [1], [0, 0, 1, 1], [], []>} : vector<8x16xbf16>, vector<16x512xbf16>, vector<8x512xf32> -> vector<8x512xf32>
    %12 = vector.broadcast %5 : vector<1x512xf32> to vector<8x512xf32>
    %13 = arith.addf %11, %12 : vector<8x512xf32>
    %14 = vector.extract_strided_slice %13 {offsets = [0, 0], sizes = [8, 256], strides = [1, 1]} : vector<8x512xf32> to vector<8x256xf32>
    %15 = vector.extract_strided_slice %13 {offsets = [0, 256], sizes = [8, 256], strides = [1, 1]} : vector<8x512xf32> to vector<8x256xf32>
    %16 = vector.shape_cast %15 : vector<8x256xf32> to vector<8x1x256xf32>
    %17 = vector.shape_cast %14 : vector<8x256xf32> to vector<1x8x256xf32>
    %18 = vector.broadcast %16 : vector<8x1x256xf32> to vector<8x8x256xf32>
    %19 = vector.broadcast %17 : vector<1x8x256xf32> to vector<8x8x256xf32>
    %20 = arith.addf %18, %19 : vector<8x8x256xf32>
    %21 = arith.extf %7 : vector<8x8x256xbf16> to vector<8x8x256xf32>
    %22 = arith.addf %20, %21 : vector<8x8x256xf32>
    %cst_17 = arith.constant 0.000000e+00 : f32
    %23 = vector.broadcast %cst_17 : f32 to vector<8x8x256xf32>
    %24 = arith.cmpf ogt, %22, %23 : vector<8x8x256xf32>
    %cst_18 = arith.constant 2.000000e-01 : f32
    %25 = vector.broadcast %cst_18 : f32 to vector<8x8x256xf32>
    %26 = arith.mulf %25, %22 : vector<8x8x256xf32>
    %27 = arith.select %24, %22, %26 : vector<8x8x256xi1>, vector<8x8x256xf32>
    %28 = vector.shape_cast %8 : vector<1x256xf32> to vector<1x1x256xf32>
    %29 = vector.broadcast %28 : vector<1x1x256xf32> to vector<8x8x256xf32>
    %30 = arith.mulf %27, %29 : vector<8x8x256xf32>
    %cst_19 = arith.constant dense<0.000000e+00> : vector<8x8xf32>
    %31 = vector.multi_reduction <add>, %30, %cst_19 [2] : vector<8x8x256xf32> to vector<8x8xf32>
    %32 = arith.addf %31, %1 : vector<8x8xf32>
    %cst_20 = arith.constant dense<0xFF800000> : vector<8xf32>
    %33 = vector.multi_reduction <maximumf>, %32, %cst_20 [1] : vector<8x8xf32> to vector<8xf32>
    %34 = vector.shape_cast %33 : vector<8xf32> to vector<8x1xf32>
    %35 = vector.broadcast %34 : vector<8x1xf32> to vector<8x8xf32>
    %36 = arith.subf %32, %35 : vector<8x8xf32>
    %37 = math.exp %36 : vector<8x8xf32>
    %cst_21 = arith.constant dense<0.000000e+00> : vector<8xf32>
    %38 = vector.multi_reduction <add>, %37, %cst_21 [1] : vector<8x8xf32> to vector<8xf32>
    %39 = vector.shape_cast %38 : vector<8xf32> to vector<8x1xf32>
    %40 = tpu.reciprocal %39 {approx = true} : vector<8x1xf32> -> vector<8x1xf32>
    %41 = vector.broadcast %40 : vector<8x1xf32> to vector<8x8xf32>
    %42 = arith.mulf %37, %41 : vector<8x8xf32>
    %43 = arith.truncf %42 : vector<8x8xf32> to vector<8x8xbf16>
    %44 = arith.truncf %14 : vector<8x256xf32> to vector<8x256xbf16>
    %cst_22 = arith.constant dense<0.000000e+00> : vector<8x256xf32>
    %45 = tpu.matmul %43, %44, %cst_22 {dimension_numbers = #tpu.dot_dimension_numbers<[1], [0], [0], [1], [0, 0, 1, 1], [], []>} : vector<8x8xbf16>, vector<8x256xbf16>, vector<8x256xf32> -> vector<8x256xf32>
    %46 = vector.broadcast %9 : vector<1x256xf32> to vector<8x256xf32>
    %47 = arith.addf %45, %46 : vector<8x256xf32>
    %c0_23 = arith.constant 0 : index
    %c0_24 = arith.constant 0 : index
    %48 = vector.load %arg9[%c0_23, %c0_24] : memref<256x256xbf16, #tpu.memory_space<vmem>>, vector<256x256xbf16>
    %c0_25 = arith.constant 0 : index
    %c0_26 = arith.constant 0 : index
    %49 = vector.load %arg10[%c0_25, %c0_26] : memref<1x256xf32, #tpu.memory_space<vmem>>, vector<1x256xf32>
    %c0_27 = arith.constant 0 : index
    %c0_28 = arith.constant 0 : index
    %c0_29 = arith.constant 0 : index
    %c0_30 = arith.constant 0 : index
    %50 = vector.load %arg4[%c0_27, %c0_28, %c0_29, %c0_30] : memref<1x8x8x128xbf16, #tpu.memory_space<vmem>>, vector<1x8x8x128xbf16>
    %51 = vector.shape_cast %50 : vector<1x8x8x128xbf16> to vector<8x8x128xbf16>
    %c0_31 = arith.constant 0 : index
    %c0_32 = arith.constant 0 : index
    %52 = vector.load %arg11[%c0_31, %c0_32] : memref<1x128xf32, #tpu.memory_space<vmem>>, vector<1x128xf32>
    %c0_33 = arith.constant 0 : index
    %c0_34 = arith.constant 0 : index
    %53 = vector.load %arg12[%c0_33, %c0_34] : memref<1x128xf32, #tpu.memory_space<vmem>>, vector<1x128xf32>
    %54 = arith.truncf %47 : vector<8x256xf32> to vector<8x256xbf16>
    %cst_35 = arith.constant dense<0.000000e+00> : vector<8x256xf32>
    %55 = tpu.matmul %54, %48, %cst_35 {dimension_numbers = #tpu.dot_dimension_numbers<[1], [0], [0], [1], [0, 0, 1, 1], [], []>} : vector<8x256xbf16>, vector<256x256xbf16>, vector<8x256xf32> -> vector<8x256xf32>
    %56 = vector.broadcast %49 : vector<1x256xf32> to vector<8x256xf32>
    %57 = arith.addf %55, %56 : vector<8x256xf32>
    %58 = vector.extract_strided_slice %57 {offsets = [0, 0], sizes = [8, 128], strides = [1, 1]} : vector<8x256xf32> to vector<8x128xf32>
    %59 = vector.extract_strided_slice %57 {offsets = [0, 128], sizes = [8, 128], strides = [1, 1]} : vector<8x256xf32> to vector<8x128xf32>
    %60 = vector.shape_cast %59 : vector<8x128xf32> to vector<8x1x128xf32>
    %61 = vector.shape_cast %58 : vector<8x128xf32> to vector<1x8x128xf32>
    %62 = vector.broadcast %60 : vector<8x1x128xf32> to vector<8x8x128xf32>
    %63 = vector.broadcast %61 : vector<1x8x128xf32> to vector<8x8x128xf32>
    %64 = arith.addf %62, %63 : vector<8x8x128xf32>
    %65 = arith.extf %51 : vector<8x8x128xbf16> to vector<8x8x128xf32>
    %66 = arith.addf %64, %65 : vector<8x8x128xf32>
    %cst_36 = arith.constant 0.000000e+00 : f32
    %67 = vector.broadcast %cst_36 : f32 to vector<8x8x128xf32>
    %68 = arith.cmpf ogt, %66, %67 : vector<8x8x128xf32>
    %cst_37 = arith.constant 2.000000e-01 : f32
    %69 = vector.broadcast %cst_37 : f32 to vector<8x8x128xf32>
    %70 = arith.mulf %69, %66 : vector<8x8x128xf32>
    %71 = arith.select %68, %66, %70 : vector<8x8x128xi1>, vector<8x8x128xf32>
    %72 = vector.shape_cast %52 : vector<1x128xf32> to vector<1x1x128xf32>
    %73 = vector.broadcast %72 : vector<1x1x128xf32> to vector<8x8x128xf32>
    %74 = arith.mulf %71, %73 : vector<8x8x128xf32>
    %cst_38 = arith.constant dense<0.000000e+00> : vector<8x8xf32>
    %75 = vector.multi_reduction <add>, %74, %cst_38 [2] : vector<8x8x128xf32> to vector<8x8xf32>
    %76 = arith.addf %75, %1 : vector<8x8xf32>
    %cst_39 = arith.constant dense<0xFF800000> : vector<8xf32>
    %77 = vector.multi_reduction <maximumf>, %76, %cst_39 [1] : vector<8x8xf32> to vector<8xf32>
    %78 = vector.shape_cast %77 : vector<8xf32> to vector<8x1xf32>
    %79 = vector.broadcast %78 : vector<8x1xf32> to vector<8x8xf32>
    %80 = arith.subf %76, %79 : vector<8x8xf32>
    %81 = math.exp %80 : vector<8x8xf32>
    %cst_40 = arith.constant dense<0.000000e+00> : vector<8xf32>
    %82 = vector.multi_reduction <add>, %81, %cst_40 [1] : vector<8x8xf32> to vector<8xf32>
    %83 = vector.shape_cast %82 : vector<8xf32> to vector<8x1xf32>
    %84 = tpu.reciprocal %83 {approx = true} : vector<8x1xf32> -> vector<8x1xf32>
    %85 = vector.broadcast %84 : vector<8x1xf32> to vector<8x8xf32>
    %86 = arith.mulf %81, %85 : vector<8x8xf32>
    %87 = arith.truncf %86 : vector<8x8xf32> to vector<8x8xbf16>
    %88 = arith.truncf %58 : vector<8x128xf32> to vector<8x128xbf16>
    %cst_41 = arith.constant dense<0.000000e+00> : vector<8x128xf32>
    %89 = tpu.matmul %87, %88, %cst_41 {dimension_numbers = #tpu.dot_dimension_numbers<[1], [0], [0], [1], [0, 0, 1, 1], [], []>} : vector<8x8xbf16>, vector<8x128xbf16>, vector<8x128xf32> -> vector<8x128xf32>
    %90 = vector.broadcast %53 : vector<1x128xf32> to vector<8x128xf32>
    %91 = arith.addf %89, %90 : vector<8x128xf32>
    %cst_42 = arith.constant dense<0.000000e+00> : vector<128xf32>
    %92 = vector.multi_reduction <add>, %91, %cst_42 [0] : vector<8x128xf32> to vector<128xf32>
    %93 = vector.shape_cast %92 : vector<128xf32> to vector<1x128xf32>
    %cst_43 = arith.constant 8.000000e+00 : f32
    %94 = vector.broadcast %cst_43 : f32 to vector<1x128xf32>
    %95 = arith.divf %93, %94 : vector<1x128xf32>
    %c0_44 = arith.constant 0 : index
    %c0_45 = arith.constant 0 : index
    %c0_46 = arith.constant 0 : index
    %96 = vector.load %arg13[%c0_44, %c0_45, %c0_46] : memref<1x1x128xf32, #tpu.memory_space<vmem>>, vector<1x1x128xf32>
    %97 = vector.shape_cast %96 : vector<1x1x128xf32> to vector<1x128xf32>
    %98 = vector.shape_cast %95 : vector<1x128xf32> to vector<1x1x128xf32>
    tpu.vector_store %arg13[%c0_44, %c0_45, %c0_46], %98 {strides = array<i32>} : memref<1x1x128xf32, #tpu.memory_space<vmem>>, vector<1x1x128xf32>,
    return
  }
  func.func @transform_0(%arg0: i32) -> (i32, i32, i32) {
    %c0_i32 = arith.constant 0 : i32
    %c0_i32_0 = arith.constant 0 : i32
    %c0_i32_1 = arith.constant 0 : i32
    return %arg0, %c0_i32, %c0_i32_0 : i32, i32, i32
  }
  func.func @transform_1(%arg0: i32) -> (i32, i32, i32) {
    %c0_i32 = arith.constant 0 : i32
    %c0_i32_0 = arith.constant 0 : i32
    %c0_i32_1 = arith.constant 0 : i32
    return %arg0, %c0_i32, %c0_i32_0 : i32, i32, i32
  }
  func.func @transform_2(%arg0: i32) -> (i32, i32, i32, i32) {
    %c0_i32 = arith.constant 0 : i32
    %c0_i32_0 = arith.constant 0 : i32
    %c0_i32_1 = arith.constant 0 : i32
    %c0_i32_2 = arith.constant 0 : i32
    return %arg0, %c0_i32, %c0_i32_0, %c0_i32_1 : i32, i32, i32, i32
  }
  func.func @transform_3(%arg0: i32) -> (i32, i32, i32, i32) {
    %c0_i32 = arith.constant 0 : i32
    %c0_i32_0 = arith.constant 0 : i32
    %c0_i32_1 = arith.constant 0 : i32
    %c0_i32_2 = arith.constant 0 : i32
    return %arg0, %c0_i32, %c0_i32_0, %c0_i32_1 : i32, i32, i32, i32
  }
  func.func @transform_4(%arg0: i32) -> (i32, i32) {
    %c0_i32 = arith.constant 0 : i32
    %c0_i32_0 = arith.constant 0 : i32
    %c0_i32_1 = arith.constant 0 : i32
    return %c0_i32, %c0_i32_0 : i32, i32
  }
  func.func @transform_5(%arg0: i32) -> (i32, i32) {
    %c0_i32 = arith.constant 0 : i32
    %c0_i32_0 = arith.constant 0 : i32
    %c0_i32_1 = arith.constant 0 : i32
    return %c0_i32, %c0_i32_0 : i32, i32
  }
  func.func @transform_6(%arg0: i32) -> (i32, i32) {
    %c0_i32 = arith.constant 0 : i32
    %c0_i32_0 = arith.constant 0 : i32
    %c0_i32_1 = arith.constant 0 : i32
    return %c0_i32, %c0_i32_0 : i32, i32
  }
  func.func @transform_7(%arg0: i32) -> (i32, i32) {
    %c0_i32 = arith.constant 0 : i32
    %c0_i32_0 = arith.constant 0 : i32
    %c0_i32_1 = arith.constant 0 : i32
    return %c0_i32, %c0_i32_0 : i32, i32
  }
  func.func @transform_8(%arg0: i32) -> (i32, i32) {
    %c0_i32 = arith.constant 0 : i32
    %c0_i32_0 = arith.constant 0 : i32
    %c0_i32_1 = arith.constant 0 : i32
    return %c0_i32, %c0_i32_0 : i32, i32
  }
  func.func @transform_9(%arg0: i32) -> (i32, i32) {
    %c0_i32 = arith.constant 0 : i32
    %c0_i32_0 = arith.constant 0 : i32
    %c0_i32_1 = arith.constant 0 : i32
    return %c0_i32, %c0_i32_0 : i32, i32
  }
  func.func @transform_10(%arg0: i32) -> (i32, i32) {
    %c0_i32 = arith.constant 0 : i32
    %c0_i32_0 = arith.constant 0 : i32
    %c0_i32_1 = arith.constant 0 : i32
    return %c0_i32, %c0_i32_0 : i32, i32
  }
  func.func @transform_11(%arg0: i32) -> (i32, i32) {
    %c0_i32 = arith.constant 0 : i32
    %c0_i32_0 = arith.constant 0 : i32
    %c0_i32_1 = arith.constant 0 : i32
    return %c0_i32, %c0_i32_0 : i32, i32
  }
  func.func @transform_12(%arg0: i32) -> (i32, i32, i32) {
    %c0_i32 = arith.constant 0 : i32
    %c0_i32_0 = arith.constant 0 : i32
    %c0_i32_1 = arith.constant 0 : i32
    return %arg0, %c0_i32, %c0_i32_0 : i32, i32, i32
  }
}

</mosaic_0001>

<bundles_post_ra>
// kernel: tpu_custom_call.1
= control target key start
LH: loop header
LB: loop body
LE: loop exit
PB: predicated region body
PF: predicated region fallthrough
CT: control target
= control target key end

     0   :  { %s3920_s0 = inlined_call_operand.hbm [shape: f32[4,8,16], index: 0, kind: input, shape index: {}]   ;;  %s3921_s1 = inlined_call_operand.hbm [shape: f32[4,8,8], index: 1, kind: input, shape index: {}]   ;;  %s3922_s2 = inlined_call_operand.hbm [shape: bf16[4,8,8,256], index: 2, kind: input, shape index: {}]   ;;  %s3923_s3 = inlined_call_operand.hbm [shape: bf16[4,8,8,128], index: 3, kind: input, shape index: {}]   ;;  %s3924_s4 = inlined_call_operand.hbm [shape: bf16[16,512], index: 4, kind: input, shape index: {}]   ;;  %s3925_s5 = inlined_call_operand.vmem [shape: f32[1,512], index: 5, kind: input, shape index: {}]   ;;  %s3926_s6 = inlined_call_operand.vmem [shape: f32[1,256], index: 6, kind: input, shape index: {}]   ;;  %s3927_s7 = inlined_call_operand.vmem [shape: f32[1,256], index: 7, kind: input, shape index: {}]   ;;  %s3928_s8 = inlined_call_operand.hbm [shape: bf16[256,256], index: 8, kind: input, shape index: {}]   ;;  %s3929_s9 = inlined_call_operand.vmem [shape: f32[1,256], index: 9, kind: input, shape index: {}]   ;;  %s3930_s10 = inlined_call_operand.vmem [shape: f32[1,128], index: 10, kind: input, shape index: {}]   ;;  %s3931_s11 = inlined_call_operand.vmem [shape: f32[1,128], index: 11, kind: input, shape index: {}]   ;;  %s3932_s12 = inlined_call_operand.hbm [shape: f32[4,1,128], index: 12, kind: output, shape index: {}]  }
   0x1   :  { %3955 = sst [smem:[#allocation26_spill]] %s3921_s1 }
   0x2   :  { %3956 = sst [smem:[#allocation27_spill]] %s3924_s4 }
   0x3   :  { %3957 = sst [smem:[#allocation28_spill]] %s3929_s9 }
   0x4   :  { %3958 = sst [smem:[#allocation29_spill]] %s3930_s10 }
   0x5   :  { %3959 = sst [smem:[#allocation30_spill]] %s3931_s11 }
   0x6   :  { %3960 = sst [smem:[#allocation31_spill]] %s3932_s12 }
   0x7   :  { %17 = vsyncpa [#allocation3], 0 }
   0x8   :  { %19 = vsyncpa [#allocation3 + $0x1], 0 }
   0x9   :  { %20 = vsyncpa [#allocation6], 0 }
   0xa   :  { %22 = vsyncpa [#allocation6 + $0x1], 0 }
   0xb   :  { %23 = vsyncpa [#allocation9], 0 }
   0xc   :  { %25 = vsyncpa [#allocation9 + $0x1], 0 }
   0xd   :  { %26 = vsyncpa [#allocation12], 0 }
   0xe   :  { %27 = vsyncpa [#allocation4], 0 }
   0xf   :  { %29 = vsyncpa [#allocation4 + $0x1], 0  ;;  %s3131_s21 = smov 0   ;;  %s3133_s22 = smov 0  }
  0x10   :  { %s3135_s23 = smov 0   ;;  %s3137_s24 = smov 0  }
  0x11 LB: > { %3961 = sst [smem:[#allocation20_spill]] %s3035_s21  ;;  %s3152_s25 = sadd.s32 4294967295, %s3047_s24   ;;  %s3047_s24 = sphi %s3137_s24, %s4000_s24   ;;  %s3043_s23 = sphi %s3135_s23, %s4002_s23   ;;  %s3039_s22 = sphi %s3133_s22, %s4004_s22   ;;  %s3035_s21 = sphi %s3131_s21, %s4003_s21  }
  0x12   : > { %3962 = sst [smem:[#allocation21_spill]] %s3043_s23  ;;  %s2508_s26 = sadd.s32 4294967294, %s3047_s24  }
  0x13   : > { %p55_p0 = scmp.ne.s32.totalorder %s3039_s22, %s3035_s21  ;;  %p3937_p1 = scmp.eq.s32.totalorder %s3152_s25, 0 }
  0x14   : > { %p331_p3 = scmp.eq.s32.totalorder %s2508_s26, 3  ;;  %p2509_p5 = scmp.ge.s32.totalorder %s3047_s24, 1 }
  0x15   : > { %p3161_p4 = por %p3937_p1, %p55_p0  ;;  %p338_p7 = scmp.lt.s32.totalorder %s3047_s24, 5 }
  0x16   : > { %p3166_p6 = por %p331_p3, %p55_p0  ;;  %s3049_s30 = smov [#allocation10]  }
  0x17   : > { %s3963_s27 = scalar_select %p3161_p4, 1, 0 }
  0x18   : > { %s3964_s28 = scalar_select %p3166_p6, 1, 0 }
  0x19   : > { %p3171_p8 = pnand %p2509_p5, %p338_p7  ;;  %s350_s13 = sshll.u32 %s3049_s30, 4  ;;  %s351_s13 = int_to_ptr.vmem [resolvable:$true] %s350_s13 }
  0x1a   : > { %3965 = sst [smem:[#allocation22_spill]] %s3964_s28  ;;  %s3184_s15 = sadd.s32 1, %s3047_s24  }
  0x1b   : > { %s3966_s29 = scalar_select %p3171_p8, 1, 0 }
  0x1c   : > { %p2623_p9 = pneg %p3171_p8  ;;  %3968 = sst [smem:[#allocation23_spill]] %s3184_s15 }
  0x1d   : > { %s42_s16 = sadd.s32 1, %s3043_s23  ;;  %s39_s17 = ssub.s32 %s3047_s24, %s3184_s15 }
  0x1e   : > { %p3179_p10 = pnand %p2623_p9, %p3937_p1  ;;  %s3969_s4 = sld [smem:[#allocation27_spill]] }
  0x20   : > { %s3967_s14 = scalar_select %p3179_p10, 1, 0 }
  0x21   : > { %p3945_p12 = pneg %p3179_p10 }
  0x24   : > { %s2789_s20 = scalar_lea.hbm %s3969_s4, 512 }
  0x25   : > { %p2790_p11 = scmp.ne.s32.totalorder %s3969_s4, %s2789_s20  ;;  %p2796_p3 = scmp.lt.u32.totalorder %s2789_s20, %s3969_s4 }
  0x27   : > { %p2792_p13 = pnand %p3945_p12, %p2790_p11 }
  0x29   : > { %p2793_p0 = pneg %p2792_p13 }
  0x2b   : > { %p2798_p5 = pnand %p2796_p3, %p2793_p0 }
  0x2d   : > { %2801 = shalt.err (!%p2798_p5)
}
  0x2e   : > { %s2802_s15 = scalar_lea.vmem %s351_s13, 512  ;;  %p2810_p2 = scmp.lt.s32.totalorder %s351_s13, %s351_s13 }
  0x2f   : > { %p2803_p7 = scmp.ne.s32.totalorder %s351_s13, %s2802_s15  ;;  %p2811_p6 = scmp.lt.s32.totalorder %s2802_s15, %s2802_s15 }
  0x31   : > { %p2805_p9 = pnand %p2803_p7, %p3945_p12  ;;  %p2812_p4 = por %p2811_p6, %p2810_p2 }
  0x33   : > { %p2806_p1 = pneg %p2805_p9 }
  0x35   : > { %p2813_p8 = pnand %p2812_p4, %p2806_p1 }
  0x37   : > { %2816 = shalt.err (!%p2813_p8)
}
  0x38   : > { %s3050_s18 = smov 256   ;;  %s3051_s21 = smov 16  }
  0x39   : > { %2626 = dma.hbm_to_vmem [thread:$0]  (!%p3179_p10), %s3969_s4, 512, %s351_s13, [#allocation9], %s3050_s18, %s3050_s18, %s3051_s21  }
  0x3a   : > { %p40_p1 = scmp.eq.s32.totalorder %s39_s17, 0  ;;  %p49_p2 = scmp.ne.s32.totalorder %s3043_s23, %s3039_s22 }
  0x3b   : > { %p50_p4 = scmp.eq.s32.totalorder %s3047_s24, 0  ;;  %p2649_p6 = scmp.lt.s32.totalorder %s3047_s24, 4 }
  0x3c   : > { %s3216_s15 = scalar_select %p40_p1, %s3043_s23, %s42_s16  }
  0x3d   : > { %p51_p8 = por %p50_p4, %p49_p2  ;;  %p3971_p11 = scmp.eq.s32.totalorder %s3152_s25, 3 }
  0x3e   : > { %3970 = sst [smem:[#allocation24_spill]] %s3216_s15  ;;  %s3225_s26 = sand.u32 1, %s3043_s23  }
  0x3f   : > { %p3220_p13 = por %p3971_p11, %p49_p2  ;;  %s3943_s30 = sshll.u32 %s3047_s24, 7 }
  0x40   : > { %s3942_s28 = sshll.u32 %s3225_s26, 3  ;;  %p3229_p0 = pnand %p2649_p6, %p51_p8 }
  0x41   : > { %s3972_s20 = scalar_select %p3220_p13, 1, 0 }
  0x42   : > { %s3974_s13 = scalar_select %p3229_p0, 1, 0 }
  0x43   : > { %3973 = sst [smem:[#allocation25_spill]] %s3972_s20  ;;  %s3944_s17 = sand.u32 1, %s3047_s24  }
  0x44   : > { %s3975_s1 = sld [smem:[#allocation26_spill]]  ;;  %s417_s19 = scalar_lea.vmem [#allocation5], %s3942_s28 }
  0x45   : > { %s424_s4 = sshll.u32 %s417_s19, 4  ;;  %s3247_s15 = scalar_lea.sflag [#allocation6], %s3944_s17  ;;  %s3243_s4 = int_to_ptr.vmem [resolvable:$true] %s424_s4 }
  0x46   : > { %p3253_p5 = pneg %p3229_p0 }
  0x48   : > { %s3976_s12 = scalar_select %p3253_p5, 1, 0 }
  0x4a   : > { %s3239_s21 = scalar_lea.hbm %s3975_s1, %s3943_s30  ;;  %s2822_s19 = scalar_lea.hbm %s3975_s1, 512 }
  0x4b   : > { %s2817_s23 = scalar_lea.hbm %s3239_s21, 128  ;;  %p2823_p1 = scmp.lt.u32.totalorder %s3239_s21, %s3975_s1 }
  0x4c   : > { %p2818_p3 = scmp.ne.s32.totalorder %s3239_s21, %s2817_s23  ;;  %p2824_p2 = scmp.lt.u32.totalorder %s2822_s19, %s2817_s23 }
  0x4d   : > { %p2826_p6 = scmp.lt.u32.totalorder %s2817_s23, %s3239_s21 }
  0x4e   : > { %p2820_p7 = pnand %p3253_p5, %p2818_p3  ;;  %p2825_p4 = por %p2824_p2, %p2823_p1 }
  0x50   : > { %p2821_p9 = pneg %p2820_p7  ;;  %p2827_p8 = por %p2826_p6, %p2825_p4 }
  0x52   : > { %p2828_p11 = pnand %p2827_p8, %p2821_p9 }
  0x54   : > { %2831 = shalt.err (!%p2828_p11)
}
  0x55   : > { %s2832_s17 = scalar_lea.vmem %s3243_s4, 128  ;;  %s3052_s16 = smov [#allocation5]  }
  0x56   : > { %p2833_p3 = scmp.ne.s32.totalorder %s3243_s4, %s2832_s17  ;;  %s2837_s18 = sshll.u32 %s3052_s16, 4  ;;  %s2838_s18 = int_to_ptr.vmem [resolvable:$false] %s2837_s18 }
  0x57   : > { %s2839_s30 = scalar_lea.vmem %s2838_s18, 256  ;;  %p2840_p13 = scmp.lt.s32.totalorder %s3243_s4, %s2838_s18 }
  0x58   : > { %p2835_p7 = pnand %p2833_p3, %p3253_p5  ;;  %p2841_p10 = scmp.lt.s32.totalorder %s2839_s30, %s2832_s17 }
  0x5a   : > { %p2836_p12 = pneg %p2835_p7  ;;  %p2842_p1 = por %p2841_p10, %p2840_p13 }
  0x5c   : > { %p2843_p2 = pnand %p2842_p1, %p2836_p12 }
  0x5e   : > { %2846 = shalt.err (!%p2843_p2)
}
  0x5f   : > { %2636 = dma.hbm_to_vmem [thread:$0]  (!%p3229_p0), %s3239_s21, 128, %s3243_s4, %s3247_s15  }
  0x60   : > { %s3053_s23 = smov [#allocation11]   ;;  %s2847_s16 = scalar_lea.hbm %s3928_s8, 4096 }
  0x61   : > { %s372_s28 = sshll.u32 %s3053_s23, 4  ;;  %p2848_p10 = scmp.ne.s32.totalorder %s3928_s8, %s2847_s16  ;;  %s373_s28 = int_to_ptr.vmem [resolvable:$true] %s372_s28 }
  0x62   : > { %p3977_p12 = scmp.ne.s32.totalorder %s3967_s14, 0  ;;  %p2854_p6 = scmp.lt.u32.totalorder %s2847_s16, %s3928_s8 }
  0x64   : > { %p3978_p13 = pneg %p3977_p12 }
  0x66   : > { %p2850_p9 = pnand %p2848_p10, %p3978_p13 }
  0x68   : > { %p2851_p4 = pneg %p2850_p9 }
  0x6a   : > { %p2856_p8 = pnand %p2854_p6, %p2851_p4 }
  0x6c   : > { %2859 = shalt.err (!%p2856_p8)
}
  0x6d   : > { %s2860_s4 = scalar_lea.vmem %s373_s28, 4096  ;;  %p3979_p3 = pmov %p3978_p13 }
  0x6e   : > { %p2861_p11 = scmp.ne.s32.totalorder %s373_s28, %s2860_s4  ;;  %p2868_p2 = scmp.lt.s32.totalorder %s373_s28, %s373_s28 }
  0x6f   : > { %p2869_p0 = scmp.lt.s32.totalorder %s2860_s4, %s2860_s4 }
  0x70   : > { %p2863_p7 = pnand %p2861_p11, %p3979_p3 }
  0x71   : > { %p2870_p5 = por %p2869_p0, %p2868_p2 }
  0x72   : > { %p2864_p1 = pneg %p2863_p7 }
  0x74   : > { %p2871_p10 = pnand %p2870_p5, %p2864_p1 }
  0x76   : > { %2874 = shalt.err (!%p2871_p10)
}
  0x77   : > { %s3054_s1 = smov 128   ;;  %s3055_s20 = smov 8  }
  0x78   : > { %2629 = dma.hbm_to_vmem [thread:$0]  (!%p3977_p12), %s3928_s8, 4096, %s373_s28, [#allocation12], %s3054_s1, %s3054_s1, %s3055_s20  }
  0x79   : > { %s3980_s19 = sshll.u32 %s3047_s24, 7  ;;  %s3981_s30 = sshll.u32 %s3225_s26, 3 }
  0x7a   : > { %s3305_s17 = scalar_lea.hbm %s3920_s0, %s3980_s19  ;;  %s399_s4 = scalar_lea.vmem [#allocation2], %s3981_s30 }
  0x7b   : > { %s406_s14 = sshll.u32 %s399_s4, 4  ;;  %s2517_s11 = sshll.u32 %s3225_s26, 6  ;;  %s407_s14 = int_to_ptr.vmem [resolvable:$true] %s406_s14 }
  0x7c   : > { %s396_s10 = scalar_lea.sflag [#allocation3], %s3225_s26  ;;  %s2875_s9 = scalar_lea.hbm %s3305_s17, 128 }
  0x7d   : > { %p2876_p0 = scmp.ne.s32.totalorder %s3305_s17, %s2875_s9  ;;  %p3982_p5 = scmp.ne.s32.totalorder %s3976_s12, 0 }
  0x7e   : > { %s2880_s23 = scalar_lea.hbm %s3920_s0, 512  ;;  %p2881_p9 = scmp.lt.u32.totalorder %s3305_s17, %s3920_s0 }
  0x7f   : > { %p2878_p12 = pnand %p2876_p0, %p3982_p5  ;;  %p2882_p4 = scmp.lt.u32.totalorder %s2880_s23, %s2875_s9 }
  0x80   : > { %p2884_p8 = scmp.lt.u32.totalorder %s2875_s9, %s3305_s17 }
  0x81   : > { %p2879_p13 = pneg %p2878_p12  ;;  %p2883_p6 = por %p2882_p4, %p2881_p9 }
  0x83   : > { %p2885_p11 = por %p2884_p8, %p2883_p6 }
  0x85   : > { %p2886_p3 = pnand %p2885_p11, %p2879_p13 }
  0x87   : > { %2889 = shalt.err (!%p2886_p3)
}
  0x88   : > { %s2890_s18 = scalar_lea.vmem %s407_s14, 128  ;;  %s3056_s30 = smov [#allocation2]  }
  0x89   : > { %p2891_p7 = scmp.ne.s32.totalorder %s407_s14, %s2890_s18  ;;  %s2895_s4 = sshll.u32 %s3056_s30, 4  ;;  %s2896_s4 = int_to_ptr.vmem [resolvable:$false] %s2895_s4 }
  0x8a   : > { %s2897_s28 = scalar_lea.vmem %s2896_s4, 256  ;;  %p2898_p10 = scmp.lt.s32.totalorder %s407_s14, %s2896_s4 }
  0x8b   : > { %p2893_p1 = pnand %p2891_p7, %p3982_p5  ;;  %p2899_p0 = scmp.lt.s32.totalorder %s2897_s28, %s2890_s18 }
  0x8d   : > { %p2894_p2 = pneg %p2893_p1  ;;  %p2900_p12 = por %p2899_p0, %p2898_p10 }
  0x8f   : > { %p2901_p4 = pnand %p2900_p12, %p2894_p2 }
  0x91   : > { %2904 = shalt.err (!%p2901_p4)
}
  0x92   : > { %p3983_p9 = scmp.ne.s32.totalorder %s3974_s13, 0  ;;  %s2576_s9 = sshll.u32 %s3047_s24, 10 }
  0x93   : > { %s435_s21 = scalar_lea.vmem [#allocation7], %s2517_s11  ;;  %s3334_s30 = scalar_lea.hbm %s3922_s2, %s2576_s9 }
  0x94   : > { %2633 = dma.hbm_to_vmem [thread:$0]  (!%p3983_p9), %s3305_s17, 128, %s407_s14, %s396_s10  }
  0x95   : > { %s442_s23 = sshll.u32 %s435_s21, 4  ;;  %s2905_s18 = scalar_lea.hbm %s3334_s30, 1024  ;;  %s3336_s23 = int_to_ptr.vmem [resolvable:$true] %s442_s23 }
  0x96   : > { %p2906_p13 = scmp.ne.s32.totalorder %s3334_s30, %s2905_s18  ;;  %s2910_s11 = scalar_lea.hbm %s3922_s2, 4096 }
  0x97   : > { %p2911_p11 = scmp.lt.u32.totalorder %s3334_s30, %s3922_s2  ;;  %p2912_p3 = scmp.lt.u32.totalorder %s2910_s11, %s2905_s18 }
  0x98   : > { %p2908_p6 = pnand %p2906_p13, %p3982_p5  ;;  %p2914_p1 = scmp.lt.u32.totalorder %s2905_s18, %s3334_s30 }
  0x99   : > { %p2913_p7 = por %p2912_p3, %p2911_p11 }
  0x9a   : > { %p2909_p8 = pneg %p2908_p6 }
  0x9b   : > { %p2915_p2 = por %p2914_p1, %p2913_p7 }
  0x9d   : > { %p2916_p10 = pnand %p2915_p2, %p2909_p8 }
  0x9f   : > { %2919 = shalt.err (!%p2916_p10)
}
  0xa0   : > { %s2920_s28 = scalar_lea.vmem %s3336_s23, 1024  ;;  %s3057_s9 = smov [#allocation7]  }
  0xa1   : > { %p2921_p0 = scmp.ne.s32.totalorder %s3336_s23, %s2920_s28  ;;  %s2925_s21 = sshll.u32 %s3057_s9, 4  ;;  %s2926_s21 = int_to_ptr.vmem [resolvable:$false] %s2925_s21 }
  0xa2   : > { %s2927_s19 = scalar_lea.vmem %s2926_s21, 2048  ;;  %p2928_p13 = scmp.lt.s32.totalorder %s3336_s23, %s2926_s21 }
  0xa3   : > { %p2923_p12 = pnand %p2921_p0, %p3982_p5  ;;  %p2929_p6 = scmp.lt.s32.totalorder %s2927_s19, %s2920_s28 }
  0xa5   : > { %p2924_p4 = pneg %p2923_p12  ;;  %p2930_p11 = por %p2929_p6, %p2928_p13 }
  0xa7   : > { %p2931_p3 = pnand %p2930_p11, %p2924_p4 }
  0xa9   : > { %2934 = shalt.err (!%p2931_p3)
}
  0xaa   : > { %2639 = dma.hbm_to_vmem [thread:$0]  (!%p3983_p9), %s3334_s30, 1024, %s3336_s23, %s3247_s15, %s3054_s1, %s3054_s1, %s3055_s20  }
  0xab   : > { %s2520_s16 = sshll.u32 %s3225_s26, 5  ;;  %s2577_s18 = sshll.u32 %s3047_s24, 9 }
  0xac   : > { %s3368_s11 = scalar_lea.hbm %s3923_s3, %s2577_s18  ;;  %s456_s14 = scalar_lea.vmem [#allocation8], %s2520_s16 }
  0xad   : > { %s463_s4 = sshll.u32 %s456_s14, 4  ;;  %s3984_s28 = sand.u32 1, %s3047_s24   ;;  %s3370_s4 = int_to_ptr.vmem [resolvable:$true] %s463_s4 }
  0xae   : > { %s3374_s9 = scalar_lea.sflag [#allocation9], %s3984_s28  ;;  %s2935_s21 = scalar_lea.hbm %s3368_s11, 512 }
  0xaf   : > { %p2936_p8 = scmp.ne.s32.totalorder %s3368_s11, %s2935_s21  ;;  %s2940_s1 = scalar_lea.hbm %s3923_s3, 2048 }
  0xb0   : > { %p2941_p2 = scmp.lt.u32.totalorder %s3368_s11, %s3923_s3  ;;  %p2942_p10 = scmp.lt.u32.totalorder %s2940_s1, %s2935_s21 }
  0xb1   : > { %p2938_p7 = pnand %p2936_p8, %p3982_p5  ;;  %p2944_p12 = scmp.lt.u32.totalorder %s2935_s21, %s3368_s11 }
  0xb2   : > { %p2943_p0 = por %p2942_p10, %p2941_p2 }
  0xb3   : > { %p2939_p1 = pneg %p2938_p7 }
  0xb4   : > { %p2945_p4 = por %p2944_p12, %p2943_p0 }
  0xb6   : > { %p2946_p13 = pnand %p2945_p4, %p2939_p1 }
  0xb8   : > { %2949 = shalt.err (!%p2946_p13)
}
  0xb9   : > { %s2950_s30 = scalar_lea.vmem %s3370_s4, 512  ;;  %s3058_s19 = smov [#allocation8]  }
  0xba   : > { %p2951_p6 = scmp.ne.s32.totalorder %s3370_s4, %s2950_s30  ;;  %s2955_s16 = sshll.u32 %s3058_s19, 4  ;;  %s2956_s16 = int_to_ptr.vmem [resolvable:$false] %s2955_s16 }
  0xbb   : > { %s2957_s18 = scalar_lea.vmem %s2956_s16, 1024  ;;  %p2958_p8 = scmp.lt.s32.totalorder %s3370_s4, %s2956_s16 }
  0xbc   : > { %p2953_p11 = pnand %p2951_p6, %p3982_p5  ;;  %p2959_p7 = scmp.lt.s32.totalorder %s2957_s18, %s2950_s30 }
  0xbe   : > { %p2954_p3 = pneg %p2953_p11  ;;  %p2960_p2 = por %p2959_p7, %p2958_p8 }
  0xc0   : > { %p2961_p10 = pnand %p2960_p2, %p2954_p3 }
  0xc2   : > { %2964 = shalt.err (!%p2961_p10)
}
  0xc3   : > { %s3059_s10 = smov 64   ;;  %s3060_s17 = smov 4  }
  0xc4   : > { %2642 = dma.hbm_to_vmem [thread:$0]  (!%p3983_p9), %s3368_s11, 512, %s3370_s4, %s3374_s9, %s3059_s10, %s3059_s10, %s3060_s17  }
  0xc5   : > { %p3985_p5 = scmp.ne.s32.totalorder %s3966_s29, 0 }
  0xc6   : > { %s3401_s12 = sand.u32 (!%p3985_p5), 1, %s3039_s22   ;;  %p3986_p1 = scmp.ne.s32.totalorder (!%p3985_p5), %s3963_s27, 0 }
  0xc7   : > { %475 = sbr.rel (%p3985_p5) target bundleno = 3031 (0xbd7), region = 68  ;;  %s2524_s14 = sshll.u32 (!%p3985_p5), %s3401_s12, 3 }
  0xc8   : > { %s478_s28 = scalar_lea.sflag (!%p3985_p5), [#allocation3], %s3401_s12  ;;  %s481_s21 = scalar_lea.vmem (!%p3985_p5), [#allocation2], %s2524_s14 }
  0xce   : > { %3010 = dma.done.wait (%p3986_p1), %s478_s28, 128  }
  0xcf   : > { %3012 = vsyncadd (%p3986_p1), %s478_s28, 4294967168  ;;  %s486_s13 = sand.u32 1, %s3152_s25   ;;  %s3410_s29 = scalar_lea.vmem [#allocation5], %s2524_s14 }
  0xd0   : > { %s487_s11 = scalar_lea.sflag [#allocation6], %s486_s13 }
  0xd1   : > { %3014 = dma.done.wait (%p3986_p1), %s487_s11, 1152  }
  0xd2   : > { %3016 = vsyncadd (%p3986_p1), %s487_s11, 4294966144  ;;  %s2526_s4 = sshll.u32 %s3401_s12, 6  ;;  %s2527_s9 = sshll.u32 %s3401_s12, 5 }
  0xd3   : > { %s3418_s15 = scalar_lea.vmem [#allocation7], %s2526_s4  ;;  %s505_s26 = scalar_lea.sflag [#allocation9], %s486_s13 }
  0xd4   : > { %s3420_s1 = scalar_lea.vmem [#allocation8], %s2527_s9 }
  0xd5   : > { %3018 = dma.done.wait (%p3986_p1), %s505_s26, 512  }
  0xd6   : > { %3020 = vsyncadd (%p3986_p1), %s505_s26, 4294966784  ;;  %p3987_p9 = scmp.eq.s32.totalorder %s3152_s25, 0 }
  0xd8   : > { %3022 = dma.done.wait (%p3987_p9), [#allocation9], 512   ;;  %p3988_p0 = pmov %p3987_p9 }
  0xda   : > { %3024 = vsyncadd (%p3988_p0), [#allocation9], 4294966784  ;;  %p3989_p12 = pmov %p3988_p0 }
  0xdb   : > { %p3990_p4 = pmov %p3988_p0 }
  0xdc   : > { %3026 = dma.done.wait (%p3989_p12), [#allocation12], 4096  }
  0xdd   : > { %3028 = vsyncadd (%p3990_p4), [#allocation12], 4294963200  ;;  %v591_v0 = vlaneseq  ;;  %v3061_v1 = vmov 0   ;;  %v2699_v3 = vld [vmem:[#allocation10 + $0x4] ss:$16 sps:$4 sm:$0xff]   ;;  %vm631_vm0 = vcmask 130048  }
  0xde   : > { %667 = vmatprep.mubr.bf16.mxu0 %v3061_v1  ;;  %2697 = vset.pattern.permute.xlu0 %v3061_v1  ;;  %v2701_v6 = vld [vmem:[#allocation10] ss:$16 sps:$4 sm:$0xff]   ;;  %v2704_v9 = vld [vmem:[#allocation10 + $0xc] ss:$16 sps:$4 sm:$0xff]   ;;  %v2702_v11 = vld [vmem:[#allocation10 + $0x8] ss:$16 sps:$4 sm:$0xff]  }
  0xdf   : > { %2698 = vset.pattern.permute.xlu1 %v3061_v1  ;;  %v3435_v2 = vshrl.u32 %v591_v0, 7  ;;  %v573_v7 = vld [vmem:[%s481_s21] sm:$0xff]  ;;  %635 = vmatprep.subr.bf16.mxu0 %v2699_v3  ;;  %v3447_v12 = vld [vmem:[%s3410_s29] sm:$0xff]  ;;  %vm1448_vm1 = vcmask 1043456   ;;  %v3062_v30 = vmov 1966171168  }
  0xe0   : > { %v589_v8 = vpack.c.bf16 %v573_v7, %v573_v7  ;;  %636 = vmatpush1.bf16.msra.mxu0 %v2701_v6  ;;  %v578_v22 = vld [vmem:[%s3925_s5] sm:$0xf]  ;;  %v722_v31 = vunpack.c.l.s4 %v3062_v30  ;;  %v581_v48 = vld [vmem:[%s3418_s15 + $0x10] sm:$0xff]  ;;  %v3499_v51 = vld [vmem:[%s3418_s15 + $0x28] sm:$0xff]  ;;  %s3991_s17 = sld [smem:[#allocation28_spill]]  ;;  %s3992_s21 = sld [smem:[#allocation29_spill]] }
  0xe1   : > { %v3438_v4 = vsub.s32 0, %v3435_v2  ;;  %v3441_v5 = vsub.s32 1, %v3435_v2  ;;  %v3444_v10 = vsub.s32 2, %v3435_v2  ;;  %676 = vmatprep.subr.bf16.mxu0 %v2704_v9  ;;  %v3457_v16 = vsub.s32 3, %v3435_v2  ;;  %v579_v40 = vld [vmem:[%s3418_s15] sm:$0xff]  ;;  %v3502_v56 = vld [vmem:[%s3418_s15 + $0x8] sm:$0xff] }
  0xe2   : > { %v3462_v18 = vsub.s32 5, %v3435_v2  ;;  %v3468_v20 = vsub.s32 4, %v3435_v2  ;;  %v723_v38 = vunpack.c.0.s8 %v722_v31  ;;  %v583_v43 = vld [vmem:[%s3418_s15 + $0x20] sm:$0xff]  ;;  %v865_v50 = vunpack.c.l.bf16 %v579_v40  ;;  %v3505_v57 = vld [vmem:[%s3418_s15 + $0x18] sm:$0xff]  ;;  %v3517_v6 = vld [vmem:[%s3418_s15 + $0x30] sm:$0xff]  ;;  %s3993_s29 = sld [smem:[#allocation30_spill]] }
  0xe3   : > { %v1007_v13 = vrot.slane %v3447_v12, %v3441_v5  ;;  %v1000_v14 = vrot.slane %v3447_v12, %v3438_v4  ;;  %2534 = vmatmul.mubr.msk.bf16.vlgmr.msra.gmra.mrb[0].mxu0 %vm631_vm0, %v589_v8  ;;  %v1014_v15 = vrot.slane %v3447_v12, %v3444_v10  ;;  %v1021_v17 = vrot.slane %v3447_v12, %v3457_v16  ;;  %v587_v47 = vld [vmem:[%s3926_s6] sm:$0x3]  ;;  %v3520_v7 = vld [vmem:[%s3418_s15 + $0x38] sm:$0xff]  ;;  %s3994_s4 = sld [smem:[#allocation25_spill]]  ;;  %s2573_s9 = sshll.u32 %s3152_s25, 4 }
  0xe4   : > { %677 = vmatpush1.bf16.msra.mxu0 %v2702_v11  ;;  %708 = vmatprep.mubr.bf16.mxu0 %v3061_v1  ;;  %v1035_v19 = vrot.slane %v3447_v12, %v3462_v18  ;;  %v1028_v21 = vrot.slane %v3447_v12, %v3468_v20  ;;  %v594_v23 = vrot.slane %v578_v22, %v3438_v4  ;;  %v866_v54 = vunpack.c.h.bf16 %v579_v40  ;;  %s570_s15 = scalar_lea.vmem [#allocation13], %s3401_s12  ;;  %s3995_s20 = sld [smem:[#allocation31_spill]] }
  0xe5   : > { %1009 = vbcast.lane.b32.xlu1 %v1007_v13, 256  ;;  %1002 = vbcast.lane.b32.xlu0 %v1000_v14, 256  ;;  %v598_v24 = vrot.slane %v578_v22, %v3441_v5  ;;  %v602_v36 = vrot.slane %v578_v22, %v3444_v10  ;;  %v606_v37 = vrot.slane %v578_v22, %v3457_v16  ;;  %v873_v55 = vunpack.c.l.bf16 %v583_v43  ;;  %s2357_s26 = sshll.u32 %s570_s15, 4  ;;  %s2345_s30 = scalar_lea.sflag [#allocation4], %s3401_s12  ;;  %s3879_s26 = int_to_ptr.vmem [resolvable:$true] %s2357_s26 }
  0xe6   : > { %v3492_v45 = vsub.s32 %v723_v38, %v3435_v2  ;;  %v3508_v58 = vrot.slane %v587_v47, %v3438_v4  ;;  %v869_v59 = vunpack.c.l.bf16 %v581_v48  ;;  %v870_v60 = vunpack.c.h.bf16 %v581_v48  ;;  %s2965_s19 = scalar_lea.vmem %s3879_s26, 16  ;;  %s3065_s25 = smov [#allocation13]  }
  0xe7   : > { %v874_v61 = vunpack.c.h.bf16 %v583_v43  ;;  %v875_v3 = vunpack.c.l.bf16 %v3499_v51  ;;  %v867_v9 = vunpack.c.l.bf16 %v3502_v56  ;;  %v868_v11 = vunpack.c.h.bf16 %v3502_v56  ;;  %p2966_p13 = scmp.ne.s32.totalorder %s3879_s26, %s2965_s19  ;;  %s2969_s16 = sshll.u32 %s3065_s25, 4  ;;  %s2970_s16 = int_to_ptr.vmem [resolvable:$false] %s2969_s16 }
  0xe8   : > { %v871_v13 = vunpack.c.l.bf16 %v3505_v57  ;;  %v877_v22 = vunpack.c.l.bf16 %v3517_v6  ;;  %s2971_s18 = scalar_lea.vmem %s2970_s16, 32  ;;  %p2972_p8 = scmp.lt.s32.totalorder %s3879_s26, %s2970_s16 }
  0xe9   : > { %1016 = vbcast.lane.b32.xlu1 %v1014_v15, 256  ;;  %1030 = vbcast.lane.b32.xlu0 %v1028_v21, 256  ;;  %v872_v21 = vunpack.c.h.bf16 %v3505_v57  ;;  %p3996_p6 = scmp.ne.s32.totalorder %s3994_s4, 0  ;;  %p2973_p7 = scmp.lt.s32.totalorder %s2971_s18, %s2965_s19 }
  0xea   : > { %s3877_s23 = scalar_lea.hbm %s3995_s20, %s2573_s9 }
  0xeb   : > { %2535 = vmatmul.mubr.msk.bf16.vlgmr.msra.gmra.mrb[4].mxu0 %vm631_vm0, %v589_v8  ;;  %v876_v8 = vunpack.c.h.bf16 %v3499_v51  ;;  %p2967_p11 = pnand %p2966_p13, %p3996_p6  ;;  %p2974_p2 = por %p2973_p7, %p2972_p8 }
  0xec   : > { %1487 = vmatprep.mubr.bf16.mxu0 %v3061_v1  ;;  %v3513_v1 = vrot.slane %v587_v47, %v3441_v5 }
  0xed   : > { %1023 = vbcast.lane.b32.xlu1 %v1021_v17, 256  ;;  %p2968_p3 = pneg %p2967_p11 }
  0xef   : > { %p2975_p10 = pnand %p2974_p2, %p2968_p3 }
  0xf1   : > { %1037 = vbcast.lane.b32.xlu1 %v1035_v19, 256 }
 0x1b6   : > { %v669_v25 = vpop.f32.mrb[0].mxu0 }
 0x1b7   : > { %v3477_v26 = vadd.f32 %v669_v25, %v594_v23  ;;  %v671_v27 = vpop.f32.mrb[1].mxu0  ;;  %v878_v23 = vunpack.c.h.bf16 %v3517_v6 }
 0x1b8   : > { %v3479_v28 = vadd.f32 %v671_v27, %v598_v24  ;;  %v673_v29 = vpop.f32.mrb[2].mxu0  ;;  %v879_v24 = vunpack.c.l.bf16 %v3520_v7 }
 0x1b9   : > { %v674_v32 = vpop.f32.mrb[3].mxu0  ;;  %v1352_v33 = vpack.c.bf16 %v3477_v26, %v3477_v26 }
 0x1ba   : > { %v1353_v34 = vpack.c.bf16 %v3479_v28, %v3479_v28 }
 0x1bb   : > { %v1450_v35 = vsel %vm1448_vm1, %v1352_v33, 0 }
 0x1bc   : > { %2536 = vmatprep.subr.msk.bf16.mxu0 %vm1448_vm1, %v1353_v34 }
 0x1bd   : > { %1456 = vmatpush1.bf16.msra.mxu0 %v1450_v35 }
 0x1be   : > { %v710_v39 = vpop.f32.mrb[4].mxu0 }
 0x1bf   : > { %v711_v41 = vadd.f32 %v710_v39, %v602_v36  ;;  %v712_v42 = vpop.f32.mrb[5].mxu0 }
 0x1c0   : > { %v713_v44 = vadd.f32 %v712_v42, %v606_v37  ;;  %v714_v46 = vpop.f32.mrb[6].mxu0 }
 0x1c1   : > { %v715_v49 = vpop.f32.mrb[7].mxu0 }
 0x1c2   : > { %v719_v52 = vcombine.low %v711_v41, %v713_v44  ;;  %v720_v53 = vcombine.high %v711_v41, %v713_v44 }
 0x1c4   : > { %v727_v62 = vrot.slane %v719_v52, %v3492_v45  ;;  %v734_v63 = vrot.slane %v720_v53, %v3492_v45 }
 0x1c6   : > { %v735_v14 = vcombine.high %v727_v62, %v727_v62  ;;  %v736_v15 = vcombine.high %v734_v63, %v734_v63  ;;  %v743_v17 = vrot.slane %v727_v62, %v3492_v45  ;;  %v750_v19 = vrot.slane %v734_v63, %v3492_v45 }
 0x1c8   : > { %v3533_v25 = vrot.slane %v735_v14, %v3492_v45  ;;  %v764_v27 = vrot.slane %v736_v15, %v3492_v45  ;;  %v765_v29 = vcombine.high %v743_v17, %v743_v17  ;;  %v3536_v30 = vcombine.high %v750_v19, %v750_v19 }
 0x1c9   : > { %v772_v31 = vrot.slane %v743_v17, %v3438_v4  ;;  %v776_v32 = vrot.slane %v743_v17, %v3441_v5  ;;  %v804_v33 = vrot.slane %v750_v19, %v3438_v4  ;;  %v808_v34 = vrot.slane %v750_v19, %v3441_v5 }
 0x1ca   : > { %v3544_v35 = vcombine.high %v3533_v25, %v3533_v25  ;;  %v3546_v36 = vcombine.high %v764_v27, %v764_v27  ;;  %v788_v37 = vrot.slane %v765_v29, %v3438_v4  ;;  %v792_v38 = vrot.slane %v765_v29, %v3441_v5 }
 0x1cb   : > { %v849_v39 = vadd.f32 %v772_v31, %v3477_v26  ;;  %v850_v40 = vadd.f32 %v776_v32, %v3479_v28  ;;  %v857_v41 = vadd.f32 %v804_v33, %v3477_v26  ;;  %v858_v42 = vadd.f32 %v808_v34, %v3479_v28 }
 0x1cc   : > { %v853_v43 = vadd.f32 %v788_v37, %v3477_v26  ;;  %v854_v44 = vadd.f32 %v792_v38, %v3479_v28  ;;  %v812_v46 = vrot.slane %v764_v27, %v3438_v4  ;;  %v816_v47 = vrot.slane %v764_v27, %v3441_v5 }
 0x1cd   : > { %v881_v48 = vadd.f32 %v865_v50, %v849_v39  ;;  %v882_v49 = vadd.f32 %v866_v54, %v850_v40  ;;  %v889_v52 = vadd.f32 %v873_v55, %v857_v41  ;;  %v890_v53 = vadd.f32 %v874_v61, %v858_v42 }
 0x1ce   : > { %v885_v62 = vadd.f32 %v869_v59, %v853_v43  ;;  %v886_v63 = vadd.f32 %v870_v60, %v854_v44  ;;  %v859_v14 = vadd.f32 %v812_v46, %v3477_v26  ;;  %v860_v15 = vadd.f32 %v816_v47, %v3479_v28 }
 0x1cf   : > { %vm897_vm2 = vcmp.gt.f32.partialorder %v881_v48, 0.0  ;;  %vm898_vm3 = vcmp.gt.f32.partialorder %v882_v49, 0.0  ;;  %v913_v17 = vmul.f32 0.2, %v881_v48  ;;  %v914_v19 = vmul.f32 0.2, %v882_v49 }
 0x1d0   : > { %vm901_vm4 = vcmp.gt.f32.partialorder %v885_v62, 0.0  ;;  %vm902_vm5 = vcmp.gt.f32.partialorder %v886_v63, 0.0  ;;  %v917_v29 = vmul.f32 0.2, %v885_v62  ;;  %v918_v31 = vmul.f32 0.2, %v886_v63 }
 0x1d1   : > { %v929_v32 = vsel %vm897_vm2, %v881_v48, %v913_v17  ;;  %v930_v27 = vsel %vm898_vm3, %v882_v49, %v914_v19  ;;  %vm905_vm6 = vcmp.gt.f32.partialorder %v889_v52, 0.0  ;;  %vm906_vm7 = vcmp.gt.f32.partialorder %v890_v53, 0.0 }
 0x1d2   : > { %v956_v50 = vmul.f32 %v3508_v58, %v929_v32  ;;  %v957_v54 = vmul.f32 %v3513_v1, %v930_v27  ;;  %v933_v55 = vsel %vm901_vm4, %v885_v62, %v917_v29  ;;  %v934_v59 = vsel %vm902_vm5, %v886_v63, %v918_v31 }
 0x1d3   : > { %v960_v60 = vmul.f32 %v3508_v58, %v933_v55  ;;  %v961_v61 = vmul.f32 %v3513_v1, %v934_v59  ;;  %v921_v33 = vmul.f32 0.2, %v889_v52  ;;  %v922_v34 = vmul.f32 0.2, %v890_v53 }
 0x1d4   : > { %v972_v37 = vadd.f32 %v957_v54, %v956_v50  ;;  %v891_v38 = vadd.f32 %v875_v3, %v859_v14  ;;  %v892_v39 = vadd.f32 %v876_v8, %v860_v15  ;;  %v780_v40 = vrot.slane %v3533_v25, %v3438_v4 }
 0x1d5   : > { %v978_v41 = vadd.f32 %v961_v61, %v960_v60  ;;  %v937_v42 = vsel %vm905_vm6, %v889_v52, %v921_v33  ;;  %v938_v43 = vsel %vm906_vm7, %v890_v53, %v922_v34  ;;  %v784_v44 = vrot.slane %v3533_v25, %v3441_v5 }
 0x1d6   : > { %973 = vadd.xlane.f32.xlu0 %v972_v37  ;;  %v964_v46 = vmul.f32 %v3508_v58, %v937_v42  ;;  %v965_v47 = vmul.f32 %v3513_v1, %v938_v43  ;;  %vm907_vm8 = vcmp.gt.f32.partialorder %v891_v38, 0.0  ;;  %vm908_vm9 = vcmp.gt.f32.partialorder %v892_v39, 0.0 }
 0x1d7   : > { %979 = vadd.xlane.f32.xlu1 %v978_v41  ;;  %v923_v51 = vmul.f32 0.2, %v891_v38  ;;  %v924_v3 = vmul.f32 0.2, %v892_v39  ;;  %v851_v8 = vadd.f32 %v780_v40, %v3477_v26  ;;  %v852_v48 = vadd.f32 %v784_v44, %v3479_v28 }
 0x1d8   : > { %v984_v49 = vadd.f32 %v965_v47, %v964_v46  ;;  %v796_v52 = vrot.slane %v3544_v35, %v3438_v4  ;;  %v800_v25 = vrot.slane %v3544_v35, %v3441_v5  ;;  %v820_v53 = vrot.slane %v3536_v30, %v3438_v4 }
 0x1d9   : > { %v939_v62 = vsel %vm907_vm8, %v891_v38, %v923_v51  ;;  %v940_v63 = vsel %vm908_vm9, %v892_v39, %v924_v3  ;;  %v883_v14 = vadd.f32 %v867_v9, %v851_v8  ;;  %v884_v15 = vadd.f32 %v868_v11, %v852_v48 }
 0x1da   : > { %985 = vadd.xlane.f32.xlu0 %v984_v49  ;;  %v966_v17 = vmul.f32 %v3508_v58, %v939_v62  ;;  %v967_v19 = vmul.f32 %v3513_v1, %v940_v63  ;;  %v855_v29 = vadd.f32 %v796_v52, %v3477_v26  ;;  %v856_v35 = vadd.f32 %v800_v25, %v3479_v28 }
 0x1db   : > { %vm899_vm10 = vcmp.gt.f32.partialorder %v883_v14, 0.0  ;;  %vm900_vm11 = vcmp.gt.f32.partialorder %v884_v15, 0.0  ;;  %v915_v31 = vmul.f32 0.2, %v883_v14  ;;  %v916_v32 = vmul.f32 0.2, %v884_v15 }
 0x1dc   : > { %v987_v27 = vadd.f32 %v967_v19, %v966_v17  ;;  %v887_v9 = vadd.f32 %v871_v13, %v855_v29  ;;  %v888_v56 = vadd.f32 %v872_v21, %v856_v35  ;;  %v824_v11 = vrot.slane %v3536_v30, %v3441_v5 }
 0x1dd   : > { %v931_v50 = vsel %vm899_vm10, %v883_v14, %v915_v31  ;;  %v932_v54 = vsel %vm900_vm11, %v884_v15, %v916_v32  ;;  %v861_v55 = vadd.f32 %v820_v53, %v3477_v26  ;;  %v828_v59 = vrot.slane %v3546_v36, %v3438_v4  ;;  %v3631_v15 = vpop.permute.xlu0 %1002 }
 0x1de   : > { %988 = vadd.xlane.f32.xlu1 %v987_v27  ;;  %v958_v60 = vmul.f32 %v3508_v58, %v931_v50  ;;  %v959_v61 = vmul.f32 %v3513_v1, %v932_v54  ;;  %vm903_vm12 = vcmp.gt.f32.partialorder %v887_v9, 0.0  ;;  %vm904_vm13 = vcmp.gt.f32.partialorder %v888_v56, 0.0 }
 0x1df   : > { %v919_v13 = vmul.f32 0.2, %v887_v9  ;;  %v920_v57 = vmul.f32 0.2, %v888_v56  ;;  %v862_v21 = vadd.f32 %v824_v11, %v3479_v28  ;;  %v893_v30 = vadd.f32 %v877_v22, %v861_v55 }
 0x1e0   : > { %v975_v33 = vadd.f32 %v959_v61, %v958_v60  ;;  %v832_v34 = vrot.slane %v3546_v36, %v3441_v5  ;;  %v863_v37 = vadd.f32 %v828_v59, %v3477_v26  ;;  %v880_v38 = vunpack.c.h.bf16 %v3520_v7 }
 0x1e1   : > { %v935_v39 = vsel %vm903_vm12, %v887_v9, %v919_v13  ;;  %v936_v40 = vsel %vm904_vm13, %v888_v56, %v920_v57  ;;  %v894_v41 = vadd.f32 %v878_v23, %v862_v21  ;;  %vm909_vm14 = vcmp.gt.f32.partialorder %v893_v30, 0.0  ;;  %v3635_v19 = vpop.permute.xlu0 %1030 }
 0x1e2   : > { %976 = vadd.xlane.f32.xlu0 %v975_v33  ;;  %v962_v42 = vmul.f32 %v3508_v58, %v935_v39  ;;  %v963_v43 = vmul.f32 %v3513_v1, %v936_v40  ;;  %v925_v22 = vmul.f32 0.2, %v893_v30  ;;  %v864_v44 = vadd.f32 %v832_v34, %v3479_v28 }
 0x1e3   : > { %vm910_vm15 = vcmp.gt.f32.partialorder %v894_v41, 0.0  ;;  %v926_v36 = vmul.f32 0.2, %v894_v41  ;;  %v895_v26 = vadd.f32 %v879_v24, %v863_v37  ;;  %v3618_v53 = vsub.s32 7, %v3435_v2 }
 0x1e4   : > { %v981_v46 = vadd.f32 %v963_v43, %v962_v42  ;;  %v941_v47 = vsel %vm909_vm14, %v893_v30, %v925_v22  ;;  %v896_v51 = vadd.f32 %v880_v38, %v864_v44  ;;  %v3621_v62 = vsub.s32 6, %v3435_v2 }
 0x1e5   : > { %v942_v3 = vsel %vm910_vm15, %v894_v41, %v926_v36  ;;  %v968_v6 = vmul.f32 %v3508_v58, %v941_v47  ;;  %vm911_vm0 = vcmp.gt.f32.partialorder %v895_v26, 0.0  ;;  %v927_v23 = vmul.f32 0.2, %v895_v26 }
 0x1e6   : > { %982 = vadd.xlane.f32.xlu1 %v981_v46  ;;  %v969_v8 = vmul.f32 %v3513_v1, %v942_v3  ;;  %vm912_vm2 = vcmp.gt.f32.partialorder %v896_v51, 0.0  ;;  %v928_v48 = vmul.f32 0.2, %v896_v51  ;;  %v1049_v63 = vrot.slane %v3447_v12, %v3618_v53 }
 0x1e7   : > { %v943_v49 = vsel %vm911_vm0, %v895_v26, %v927_v23  ;;  %v1042_v14 = vrot.slane %v3447_v12, %v3621_v62  ;;  %v1102_v37 = vand.u32 127, %v591_v0  ;;  %vm1135_vm3 = vcmask 1041409  }
 0x1e8   : > { %v990_v28 = vadd.f32 %v969_v8, %v968_v6  ;;  %v944_v52 = vsel %vm912_vm2, %v896_v51, %v928_v48  ;;  %v970_v25 = vmul.f32 %v3508_v58, %v943_v49  ;;  %v3627_v58 = vpop.permute.xlu1 %1009  ;;  %vm1137_vm4 = vcmask 1042434  }
 0x1e9   : > { %v971_v7 = vmul.f32 %v3513_v1, %v944_v52  ;;  %v3668_v39 = vsub.s32 %v1102_v37, %v3435_v2  ;;  %vm1139_vm5 = vcmask 1043459   ;;  %vm1141_vm6 = vcmask 1044484  }
 0x1ea   : > { %991 = vadd.xlane.f32.xlu0 %v990_v28  ;;  %vm1143_vm7 = vcmask 1045509   ;;  %vm1145_vm8 = vcmask 1046534   ;;  %vm1147_vm9 = vcmask 1047559   ;;  %vm1150_vm10 = vcmask 64512  }
 0x1eb   : > { %v993_v24 = vadd.f32 %v971_v7, %v970_v25 }
 0x1ec   : > { %v3629_v1 = vpop.permute.xlu1 %1016 }
 0x1ed   : > { %994 = vadd.xlane.f32.xlu1 %v993_v24 }
 0x1f0   : > { %v3633_v17 = vpop.permute.xlu1 %1023 }
 0x1f4   : > { %v3637_v29 = vpop.permute.xlu1 %1037 }
 0x1fe   : > { %1051 = vbcast.lane.b32.xlu1 %v1049_v63, 256 }
 0x200   : > { %1044 = vbcast.lane.b32.xlu0 %v1042_v14, 256 }
 0x263   : > { %v974_v35 = vpop.xlane.xlu0 %973 }
 0x264   : > { %v3640_v31 = vadd.f32 %v3631_v15, %v974_v35  ;;  %v980_v32 = vpop.xlane.xlu1 %979 }
 0x265   : > { %v1063_v55 = vadd.f32 %v3629_v1, %v980_v32 }
 0x266   : > { %1078 = vperm.xlu0 %2697, %v3640_v31  }
 0x267   : > { %v986_v12 = vpop.xlane.xlu0 %985 }
 0x268   : > { %v3644_v27 = vadd.f32 %v3635_v19, %v986_v12 }
 0x26a   : > { %1090 = vperm.xlu1 %2698, %v3644_v27  }
 0x26b   : > { %v989_v9 = vpop.xlane.xlu1 %988 }
 0x26c   : > { %v3648_v56 = vadd.f32 %v3637_v29, %v989_v9 }
 0x26e   : > { %1093 = vperm.xlu0 %2697, %v3648_v56  }
 0x26f   : > { %v977_v11 = vpop.xlane.xlu0 %976 }
 0x270   : > { %v1062_v50 = vadd.f32 %v3627_v58, %v977_v11 }
 0x272   : > { %1081 = vperm.xlu1 %2698, %v1062_v50  }
 0x273   : > { %v983_v54 = vpop.xlane.xlu1 %982 }
 0x274   : > { %v1064_v59 = vadd.f32 %v3633_v17, %v983_v54 }
 0x276   : > { %1087 = vperm.xlu0 %2697, %v1064_v59   ;;  %1084 = vperm.xlu1 %2698, %v1063_v55  }
 0x277   : > { %v992_v60 = vpop.xlane.xlu0 %991 }
 0x27a   : > { %v995_v61 = vpop.xlane.xlu1 %994 }
 0x27b   : > { %v3654_v13 = vpop.permute.xlu0 %1044 }
 0x27c   : > { %v3657_v57 = vadd.f32 %v3654_v13, %v992_v60 }
 0x27e   : > { %v3659_v21 = vpop.permute.xlu1 %1051  ;;  %1096 = vperm.xlu1 %2698, %v3657_v57  }
 0x27f   : > { %v3663_v30 = vadd.f32 %v3659_v21, %v995_v61 }
 0x281   : > { %1099 = vperm.xlu0 %2697, %v3663_v30  }
 0x2e5   : > { %v1079_v33 = vpop.permute.xlu0 %1078 }
 0x2e6   : > { %v1106_v42 = vrot.slane %v1079_v33, %v3668_v39 }
 0x2e9   : > { %v1091_v34 = vpop.permute.xlu1 %1090 }
 0x2ea   : > { %v1122_v2 = vrot.slane %v1091_v34, %v3668_v39 }
 0x2ed   : > { %v1094_v38 = vpop.permute.xlu0 %1093 }
 0x2ee   : > { %v1126_v51 = vrot.slane %v1094_v38, %v3668_v39 }
 0x2f1   : > { %v1082_v40 = vpop.permute.xlu1 %1081 }
 0x2f2   : > { %v1110_v41 = vrot.slane %v1082_v40, %v3668_v39 }
 0x2f4   : > { %v1136_v36 = vsel %vm1135_vm3, %v1110_v41, %v1106_v42 }
 0x2f5   : > { %v1088_v43 = vpop.permute.xlu0 %1087  ;;  %v1085_v22 = vpop.permute.xlu1 %1084 }
 0x2f6   : > { %v1114_v44 = vrot.slane %v1085_v22, %v3668_v39  ;;  %v1118_v0 = vrot.slane %v1088_v43, %v3668_v39 }
 0x2f8   : > { %v1138_v26 = vsel %vm1137_vm4, %v1114_v44, %v1136_v36 }
 0x2f9   : > { %v1140_v46 = vsel %vm1139_vm5, %v1118_v0, %v1138_v26 }
 0x2fa   : > { %v1142_v47 = vsel %vm1141_vm6, %v1122_v2, %v1140_v46 }
 0x2fb   : > { %v1144_v6 = vsel %vm1143_vm7, %v1126_v51, %v1142_v47 }
 0x2fd   : > { %v1097_v3 = vpop.permute.xlu1 %1096 }
 0x2fe   : > { %v1130_v23 = vrot.slane %v1097_v3, %v3668_v39 }
 0x300   : > { %v1100_v8 = vpop.permute.xlu0 %1099  ;;  %v1146_v48 = vsel %vm1145_vm8, %v1130_v23, %v1144_v6 }
 0x301   : > { %v1134_v49 = vrot.slane %v1100_v8, %v3668_v39 }
 0x303   : > { %v1148_v28 = vsel %vm1147_vm9, %v1134_v49, %v1146_v48 }
 0x304   : > { %v1151_v52 = vsel %vm1150_vm10, %v1148_v28, -inf }
 0x305   : > { %1152 = vmax.xlane.f32.xlu1 %v1151_v52 }
 0x392   : > { %v1153_v25 = vpop.xlane.xlu1 %1152 }
 0x393   : > { %v1158_v7 = vrot.slane %v1153_v25, %v3438_v4  ;;  %v1162_v24 = vrot.slane %v1153_v25, %v3441_v5  ;;  %v1166_v63 = vrot.slane %v1153_v25, %v3444_v10  ;;  %v1170_v12 = vrot.slane %v1153_v25, %v3457_v16 }
 0x394   : > { %v1174_v54 = vrot.slane %v1153_v25, %v3468_v20  ;;  %v1178_v33 = vrot.slane %v1153_v25, %v3462_v18 }
 0x395   : > { %v1195_v14 = vsub.f32 %v3640_v31, %v1158_v7  ;;  %v1196_v35 = vsub.f32 %v1062_v50, %v1162_v24  ;;  %v1197_v9 = vsub.f32 %v1063_v55, %v1166_v63  ;;  %v1198_v60 = vsub.f32 %v1064_v59, %v1170_v12 }
 0x396   : > { %v1199_v34 = vsub.f32 %v3644_v27, %v1174_v54  ;;  %v1182_v31 = vrot.slane %v1153_v25, %v3621_v62  ;;  %v1200_v50 = vsub.f32 %v3648_v56, %v1178_v33  ;;  %v1186_v59 = vrot.slane %v1153_v25, %v3618_v53 }
 0x397   : > { %v1203_v32 = vmul.f32 1.442695, %v1195_v14  ;;  %v1205_v11 = vmul.f32 1.442695, %v1196_v35  ;;  %v1207_v61 = vmul.f32 1.442695, %v1197_v9 }
 0x398   : > { %v1209_v37 = vmul.f32 1.442695, %v1198_v60  ;;  %v1211_v55 = vmul.f32 1.442695, %v1199_v34  ;;  %v1201_v41 = vsub.f32 %v3657_v57, %v1182_v31  ;;  %v1213_v42 = vmul.f32 1.442695, %v1200_v50 }
 0x399   : > { %2753 = vpow2.f32 %v1203_v32  ;;  %v1202_v27 = vsub.f32 %v3663_v30, %v1186_v59 }
 0x39a   : > { %2755 = vpow2.f32 %v1205_v11  ;;  %v1215_v22 = vmul.f32 1.442695, %v1201_v41 }
 0x39b   : > { %2757 = vpow2.f32 %v1207_v61  ;;  %v1217_v56 = vmul.f32 1.442695, %v1202_v27 }
 0x39c   : > { %2759 = vpow2.f32 %v1209_v37 }
 0x39d   : > { %2761 = vpow2.f32 %v1211_v55 }
 0x39e   : > { %2763 = vpow2.f32 %v1213_v42 }
 0x39f   : > { %2765 = vpow2.f32 %v1215_v22 }
 0x3a0   : > { %2767 = vpow2.f32 %v1217_v56 }
 0x3a3   : > { %v2754_v38 = vpop.eup %2753 }
 0x3a4   : > { %1228 = vperm.xlu0 %2697, %v2754_v38   ;;  %v2756_v40 = vpop.eup %2755 }
 0x3a5   : > { %v2758_v43 = vpop.eup %2757 }
 0x3a6   : > { %v2760_v44 = vpop.eup %2759 }
 0x3a7   : > { %v2762_v36 = vpop.eup %2761 }
 0x3a8   : > { %1231 = vperm.xlu0 %2697, %v2756_v40   ;;  %v2764_v0 = vpop.eup %2763 }
 0x3a9   : > { %v2766_v2 = vpop.eup %2765 }
 0x3aa   : > { %v3699_v57 = vpop.eup %2767 }
 0x3ac   : > { %1234 = vperm.xlu0 %2697, %v2758_v43  }
 0x3b0   : > { %1237 = vperm.xlu0 %2697, %v2760_v44  }
 0x3b4   : > { %1240 = vperm.xlu0 %2697, %v2762_v36  }
 0x3b8   : > { %1243 = vperm.xlu0 %2697, %v2764_v0  }
 0x3bc   : > { %1246 = vperm.xlu0 %2697, %v2766_v2  }
 0x3c0   : > { %1249 = vperm.xlu0 %2697, %v3699_v57  }
 0x423   : > { %v1229_v26 = vpop.permute.xlu0 %1228 }
 0x424   : > { %v1254_v8 = vrot.slane %v1229_v26, %v3668_v39 }
 0x427   : > { %v1232_v46 = vpop.permute.xlu0 %1231 }
 0x428   : > { %v1258_v6 = vrot.slane %v1232_v46, %v3668_v39 }
 0x42a   : > { %v1283_v52 = vsel %vm1135_vm3, %v1258_v6, %v1254_v8 }
 0x42b   : > { %v1235_v30 = vpop.permute.xlu0 %1234 }
 0x42c   : > { %v1262_v23 = vrot.slane %v1235_v30, %v3668_v39 }
 0x42e   : > { %v1284_v7 = vsel %vm1137_vm4, %v1262_v23, %v1283_v52 }
 0x42f   : > { %v1238_v47 = vpop.permute.xlu0 %1237 }
 0x430   : > { %v1266_v48 = vrot.slane %v1238_v47, %v3668_v39 }
 0x432   : > { %v1285_v63 = vsel %vm1139_vm5, %v1266_v48, %v1284_v7 }
 0x433   : > { %v1241_v51 = vpop.permute.xlu0 %1240 }
 0x434   : > { %v1270_v49 = vrot.slane %v1241_v51, %v3668_v39 }
 0x436   : > { %v1286_v14 = vsel %vm1141_vm6, %v1270_v49, %v1285_v63  ;;  %v2708_v63 = vld [vmem:[#allocation11 + $0x14] ss:$8 sps:$4 sm:$0xff]  }
 0x437   : > { %v1244_v3 = vpop.permute.xlu0 %1243 }
 0x438   : > { %v1274_v25 = vrot.slane %v1244_v3, %v3668_v39 }
 0x43a   : > { %v1287_v32 = vsel %vm1143_vm7, %v1274_v25, %v1286_v14  ;;  %v2710_v14 = vld [vmem:[#allocation11 + $0x10] ss:$8 sps:$4 sm:$0xff]  }
 0x43b   : > { %v1247_v28 = vpop.permute.xlu0 %1246 }
 0x43c   : > { %v1278_v24 = vrot.slane %v1247_v28, %v3668_v39 }
 0x43e   : > { %v1288_v9 = vsel %vm1145_vm8, %v1278_v24, %v1287_v32  ;;  %v2707_v24 = vld [vmem:[#allocation11] ss:$8 sps:$4 sm:$0xff]   ;;  %v2714_v32 = vld [vmem:[#allocation11 + $0x34] ss:$8 sps:$4 sm:$0xff]  }
 0x43f   : > { %v1250_v35 = vpop.permute.xlu0 %1249 }
 0x440   : > { %v1282_v12 = vrot.slane %v1250_v35, %v3668_v39  ;;  %v2713_v35 = vld [vmem:[#allocation11 + $0x20] ss:$8 sps:$4 sm:$0xff]  }
 0x442   : > { %v1289_v11 = vsel %vm1147_vm9, %v1282_v12, %v1288_v9  ;;  %v2717_v12 = vld [vmem:[#allocation11 + $0x44] ss:$8 sps:$4 sm:$0xff]   ;;  %v2719_v9 = vld [vmem:[#allocation11 + $0x40] ss:$8 sps:$4 sm:$0xff]  }
 0x443   : > { %v1291_v54 = vsel %vm1150_vm10, %v1289_v11, 0.0  ;;  %v2720_v11 = vld [vmem:[#allocation11 + $0x54] ss:$8 sps:$4 sm:$0xff]  }
 0x444   : > { %1292 = vadd.xlane.f32.xlu0 %v1291_v54  ;;  %v2722_v54 = vld [vmem:[#allocation11 + $0x50] ss:$8 sps:$4 sm:$0xff]  }
 0x4d1   : > { %v1293_v60 = vpop.xlane.xlu0 %1292 }
 0x4d2   : > { %2769 = vrcp.f32 %v1293_v60  ;;  %v2723_v60 = vld [vmem:[#allocation11 + $0x64] ss:$8 sps:$4 sm:$0xff]  }
 0x4dc   : > { %v2770_v61 = vpop.eup %2769 }
 0x4dd   : > { %v1315_v33 = vrot.slane %v2770_v61, %v3468_v20  ;;  %v1299_v34 = vrot.slane %v2770_v61, %v3438_v4  ;;  %v1303_v37 = vrot.slane %v2770_v61, %v3441_v5  ;;  %v1307_v59 = vrot.slane %v2770_v61, %v3444_v10 }
 0x4de   : > { %v1311_v27 = vrot.slane %v2770_v61, %v3457_v16  ;;  %v1319_v3 = vrot.slane %v2770_v61, %v3462_v18  ;;  %v1323_v6 = vrot.slane %v2770_v61, %v3621_v62  ;;  %v1327_v49 = vrot.slane %v2770_v61, %v3618_v53  ;;  %v2725_v61 = vld [vmem:[#allocation11 + $0x60] ss:$8 sps:$4 sm:$0xff]  }
 0x4df   : > { %v1340_v31 = vmul.f32 %v2762_v36, %v1315_v33  ;;  %v1336_v50 = vmul.f32 %v2754_v38, %v1299_v34  ;;  %v1337_v55 = vmul.f32 %v2756_v40, %v1303_v37  ;;  %v1338_v46 = vmul.f32 %v2758_v43, %v1307_v59  ;;  %v2726_v33 = vld [vmem:[#allocation11 + $0x74] ss:$8 sps:$4 sm:$0xff]   ;;  %v2728_v34 = vld [vmem:[#allocation11 + $0x70] ss:$8 sps:$4 sm:$0xff]   ;;  %v2729_v37 = vld [vmem:[#allocation11 + $0x84] ss:$8 sps:$4 sm:$0xff]  }
 0x4e0   : > { %v1339_v51 = vmul.f32 %v2760_v44, %v1311_v27  ;;  %v1341_v36 = vmul.f32 %v2764_v0, %v1319_v3  ;;  %v1342_v48 = vmul.f32 %v2766_v2, %v1323_v6  ;;  %v1343_v52 = vmul.f32 %v3699_v57, %v1327_v49  ;;  %v2705_v0 = vld [vmem:[#allocation11 + $0x4] ss:$8 sps:$4 sm:$0xff]   ;;  %v2716_v57 = vld [vmem:[#allocation11 + $0x30] ss:$8 sps:$4 sm:$0xff]  }
 0x4e1   : > { %v1348_v41 = vpack.c.bf16 %v1340_v31, %v1340_v31  ;;  %v1344_v42 = vpack.c.bf16 %v1336_v50, %v1336_v50  ;;  %v1345_v26 = vpack.c.bf16 %v1337_v55, %v1337_v55  ;;  %v1346_v47 = vpack.c.bf16 %v1338_v46, %v1338_v46  ;;  %1712 = vmatprep.subr.bf16.mxu1 %v2705_v0  ;;  %v2711_v2 = vld [vmem:[#allocation11 + $0x24] ss:$8 sps:$4 sm:$0xff]   ;;  %v2731_v31 = vld [vmem:[#allocation11 + $0x80] ss:$8 sps:$4 sm:$0xff]   ;;  %v2732_v50 = vld [vmem:[#allocation11 + $0x94] ss:$8 sps:$4 sm:$0xff]  }
 0x4e2   : > { %v1347_v40 = vpack.c.bf16 %v1339_v51, %v1339_v51  ;;  %v1349_v8 = vpack.c.bf16 %v1341_v36, %v1341_v36  ;;  %v1350_v28 = vpack.c.bf16 %v1342_v48, %v1342_v48  ;;  %v1351_v25 = vpack.c.bf16 %v1343_v52, %v1343_v52  ;;  %1713 = vmatpush1.bf16.msra.mxu1 %v2707_v24  ;;  %v2734_v55 = vld [vmem:[#allocation11 + $0x90] ss:$8 sps:$4 sm:$0xff]   ;;  %v2735_v59 = vld [vmem:[#allocation11 + $0xa4] ss:$8 sps:$4 sm:$0xff]  }
 0x4e3   : > { %v1377_v22 = vunpack.c.l.b16 %v1348_v41  ;;  %v1373_v56 = vunpack.c.l.b16 %v1344_v42  ;;  %v1374_v30 = vunpack.c.l.b16 %v1345_v26  ;;  %v1375_v38 = vunpack.c.l.b16 %v1346_v47  ;;  %1714 = vmatprep.subr.bf16.mxu1 %v2708_v63  ;;  %v2737_v41 = vld [vmem:[#allocation11 + $0xa0] ss:$8 sps:$4 sm:$0xff]   ;;  %v2738_v42 = vld [vmem:[#allocation11 + $0xb4] ss:$8 sps:$4 sm:$0xff]   ;;  %v2740_v27 = vld [vmem:[#allocation11 + $0xb0] ss:$8 sps:$4 sm:$0xff]  }
 0x4e4   : > { %v1376_v23 = vunpack.c.l.b16 %v1347_v40  ;;  %v1378_v43 = vunpack.c.l.b16 %v1349_v8  ;;  %v1379_v44 = vunpack.c.l.b16 %v1350_v28  ;;  %v1380_v7 = vunpack.c.l.b16 %v1351_v25  ;;  %v2744_v26 = vld [vmem:[#allocation11 + $0xd4] ss:$8 sps:$4 sm:$0xff]   ;;  %v2746_v46 = vld [vmem:[#allocation11 + $0xd0] ss:$8 sps:$4 sm:$0xff]  }
 0x4e5   : > { %1394 = vperm.xlu0 %2697, %v1377_v22   ;;  %1382 = vperm.xlu1 %2698, %v1373_v56   ;;  %v2741_v22 = vld [vmem:[#allocation11 + $0xc4] ss:$8 sps:$4 sm:$0xff]   ;;  %v2743_v56 = vld [vmem:[#allocation11 + $0xc0] ss:$8 sps:$4 sm:$0xff]  }
 0x4e6   : > { %1715 = vmatpush1.bf16.msra.mxu1 %v2710_v14 }
 0x4e7   : > { %1716 = vmatprep.subr.bf16.mxu1 %v2711_v2 }
 0x4e9   : > { %1385 = vperm.xlu1 %2698, %v1374_v30   ;;  %v2747_v30 = vld [vmem:[#allocation11 + $0xe4] ss:$8 sps:$4 sm:$0xff]  }
 0x4ea   : > { %1717 = vmatpush1.bf16.msra.mxu1 %v2713_v35 }
 0x4eb   : > { %1718 = vmatprep.subr.bf16.mxu1 %v2714_v32 }
 0x4ed   : > { %1388 = vperm.xlu1 %2698, %v1375_v38  }
 0x4ee   : > { %1719 = vmatpush1.bf16.msra.mxu1 %v2716_v57  ;;  %v2749_v57 = vld [vmem:[#allocation11 + $0xe0] ss:$8 sps:$4 sm:$0xff]  }
 0x4ef   : > { %1720 = vmatprep.subr.bf16.mxu1 %v2717_v12  ;;  %v2750_v12 = vld [vmem:[#allocation11 + $0xf4] ss:$8 sps:$4 sm:$0xff]  }
 0x4f1   : > { %1391 = vperm.xlu1 %2698, %v1376_v23  }
 0x4f2   : > { %1721 = vmatpush1.bf16.msra.mxu1 %v2719_v9  ;;  %v2752_v9 = vld [vmem:[#allocation11 + $0xf0] ss:$8 sps:$4 sm:$0xff]  }
 0x4f3   : > { %1722 = vmatprep.subr.bf16.mxu1 %v2720_v11  ;;  %v588_v11 = vld [vmem:[%s3927_s7] sm:$0x3] }
 0x4f5   : > { %1397 = vperm.xlu1 %2698, %v1378_v43  }
 0x4f6   : > { %1723 = vmatpush1.bf16.msra.mxu1 %v2722_v54  ;;  %v1358_v54 = vrot.slane %v588_v11, %v3438_v4 }
 0x4f7   : > { %1724 = vmatprep.subr.bf16.mxu1 %v2723_v60  ;;  %v1362_v60 = vrot.slane %v588_v11, %v3441_v5 }
 0x4f9   : > { %1400 = vperm.xlu1 %2698, %v1379_v44  }
 0x4fa   : > { %1725 = vmatpush1.bf16.msra.mxu1 %v2725_v61 }
 0x4fb   : > { %1726 = vmatprep.subr.bf16.mxu1 %v2726_v33 }
 0x4fd   : > { %1403 = vperm.xlu1 %2698, %v1380_v7  }
 0x4fe   : > { %1727 = vmatpush1.bf16.msra.mxu1 %v2728_v34 }
 0x4ff   : > { %1728 = vmatprep.subr.bf16.mxu1 %v2729_v37 }
 0x502   : > { %1729 = vmatpush1.bf16.msra.mxu1 %v2731_v31 }
 0x503   : > { %1730 = vmatprep.subr.bf16.mxu1 %v2732_v50 }
 0x506   : > { %1731 = vmatpush1.bf16.msra.mxu1 %v2734_v55 }
 0x507   : > { %1732 = vmatprep.subr.bf16.mxu1 %v2735_v59 }
 0x50a   : > { %1733 = vmatpush1.bf16.msra.mxu1 %v2737_v41  ;;  %v3063_v41 = vmov 0.0  }
 0x50b   : > { %1734 = vmatprep.subr.bf16.mxu1 %v2738_v42  ;;  %2599 = vmatprep.subr.bf16.mxu0 %v3063_v41  ;;  %v1528_v42 = vld [vmem:[%s3991_s17] sm:$0x3] }
 0x50e   : > { %1735 = vmatpush1.bf16.msra.mxu1 %v2740_v27  ;;  %v1545_v27 = vrot.slane %v1528_v42, %v3438_v4 }
 0x50f   : > { %1736 = vmatprep.subr.bf16.mxu1 %v2741_v22  ;;  %v1549_v22 = vrot.slane %v1528_v42, %v3441_v5 }
 0x512   : > { %1737 = vmatpush1.bf16.msra.mxu1 %v2743_v56 }
 0x513   : > { %1738 = vmatprep.subr.bf16.mxu1 %v2744_v26 }
 0x516   : > { %1739 = vmatpush1.bf16.msra.mxu1 %v2746_v46 }
 0x517   : > { %1740 = vmatprep.subr.bf16.mxu1 %v2747_v30 }
 0x51a   : > { %1741 = vmatpush1.bf16.msra.mxu1 %v2749_v57 }
 0x51b   : > { %1742 = vmatprep.subr.bf16.mxu1 %v2750_v12 }
 0x51e   : > { %1743 = vmatpush1.bf16.msra.mxu1 %v2752_v9 }
 0x564   : > { %v1383_v47 = vpop.permute.xlu1 %1382  ;;  %v1395_v48 = vpop.permute.xlu0 %1394 }
 0x565   : > { %v1408_v23 = vrot.slane %v1383_v47, %v3668_v39  ;;  %v1424_v25 = vrot.slane %v1395_v48, %v3668_v39 }
 0x568   : > { %v1386_v51 = vpop.permute.xlu1 %1385 }
 0x569   : > { %v1412_v40 = vrot.slane %v1386_v51, %v3668_v39 }
 0x56b   : > { %v1437_v49 = vsel %vm1135_vm3, %v1412_v40, %v1408_v23 }
 0x56c   : > { %v1389_v3 = vpop.permute.xlu1 %1388 }
 0x56d   : > { %v1416_v36 = vrot.slane %v1389_v3, %v3668_v39 }
 0x56f   : > { %v1438_v43 = vsel %vm1137_vm4, %v1416_v36, %v1437_v49  ;;  %v2579_v36 = vld [vmem:[%s3420_s1] sm:$0xff]   ;;  %v2594_v49 = vld [vmem:[%s3420_s1 + $0x8] sm:$0xff]  }
 0x570   : > { %v1392_v38 = vpop.permute.xlu1 %1391 }
 0x571   : > { %v1420_v8 = vrot.slane %v1392_v38, %v3668_v39 }
 0x573   : > { %v1439_v52 = vsel %vm1139_vm5, %v1420_v8, %v1438_v43  ;;  %v2595_v43 = vld [vmem:[%s3420_s1 + $0x10] sm:$0xff]  }
 0x574   : > { %v1398_v6 = vpop.permute.xlu1 %1397  ;;  %v1440_v0 = vsel %vm1141_vm6, %v1424_v25, %v1439_v52  ;;  %v2581_v52 = vunpack.c.h.bf16 %v2579_v36 }
 0x575   : > { %v1428_v44 = vrot.slane %v1398_v6, %v3668_v39 }
 0x577   : > { %v1441_v63 = vsel %vm1143_vm7, %v1428_v44, %v1440_v0 }
 0x578   : > { %v1401_v28 = vpop.permute.xlu1 %1400 }
 0x579   : > { %v1432_v7 = vrot.slane %v1401_v28, %v3668_v39  ;;  %v2580_v28 = vunpack.c.l.bf16 %v2579_v36 }
 0x57b   : > { %v1442_v2 = vsel %vm1145_vm8, %v1432_v7, %v1441_v63  ;;  %v2584_v63 = vunpack.c.l.bf16 %v2594_v49 }
 0x57c   : > { %v1404_v24 = vpop.permute.xlu1 %1403 }
 0x57d   : > { %v1436_v14 = vrot.slane %v1404_v24, %v3668_v39 }
 0x57f   : > { %v1443_v35 = vsel %vm1147_vm9, %v1436_v14, %v1442_v2  ;;  %v2585_v14 = vunpack.c.h.bf16 %v2594_v49  ;;  %v2588_v2 = vunpack.c.l.bf16 %v2595_v43 }
 0x580   : > { %v1444_v32 = vpack.c.b16 %v1443_v35, %v1443_v35 }
 0x582   : > { %2537 = vmatmul.mubr.msk.bf16.vlgmr.msra.gmra.mrb[8].mxu0 %vm1150_vm10, %v1444_v32 }
 0x655   : > { %v1489_v61 = vpop.f32.mrb[8].mxu0 }
 0x656   : > { %v1490_v33 = vadd.f32 %v1489_v61, %v1358_v54  ;;  %v1491_v34 = vpop.f32.mrb[9].mxu0  ;;  %v2596_v61 = vld [vmem:[%s3420_s1 + $0x18] sm:$0xff]  }
 0x657   : > { %v1493_v37 = vpop.f32.mrb[10].mxu0  ;;  %v1492_v31 = vadd.f32 %v1491_v34, %v1362_v60  ;;  %v2589_v60 = vunpack.c.h.bf16 %v2595_v43 }
 0x658   : > { %v1494_v50 = vpop.f32.mrb[11].mxu0  ;;  %v1539_v59 = vpack.c.bf16 %v1490_v33, %v1490_v33 }
 0x659   : > { %v1540_v55 = vpack.c.bf16 %v1492_v31, %v1492_v31 }
 0x65b   : > { %1744 = vmatprep.mubr.bf16.mxu1 %v1540_v55 }
 0x65c   : > { %1745 = vmatmul.mubr.bf16.vlgmr.msra.gmra.mrb[0].mxu1 %v1539_v59 }
 0x72f   : > { %v1746_v56 = vpop.f32.mrb[0].mxu1 }
 0x730   : > { %v3754_v26 = vadd.f32 %v1746_v56, %v1545_v27  ;;  %v1748_v46 = vpop.f32.mrb[1].mxu1 }
 0x731   : > { %v1749_v30 = vadd.f32 %v1748_v46, %v1549_v22  ;;  %v1750_v47 = vpop.f32.mrb[2].mxu1  ;;  %v2592_v22 = vunpack.c.l.bf16 %v2596_v61  ;;  %v2570_v46 = vld [vmem:[%s3992_s21] ss:$0 sm:$0xff] }
 0x732   : > { %v1751_v51 = vpop.f32.mrb[3].mxu1  ;;  %v2202_v3 = vpack.c.bf16 %v3754_v26, %v3754_v26 }
 0x733   : > { %v1754_v38 = vcombine.high %v1749_v30, %v1749_v30  ;;  %v1761_v40 = vrot.slane %v1749_v30, %v3492_v45 }
 0x734   : > { %v2293_v6 = vsel %vm1448_vm1, %v2202_v3, 0 }
 0x735   : > { %v1768_v23 = vrot.slane %v1754_v38, %v3492_v45  ;;  %v1769_v8 = vcombine.high %v1761_v40, %v1761_v40  ;;  %v1777_v48 = vrot.slane %v1761_v40, %v3492_v45  ;;  %2600 = vmatpush3.bf16.msra.mxu0 %v2293_v6 }
 0x737   : > { %v1770_v44 = vcombine.high %v1768_v23, %v1768_v23  ;;  %v1784_v25 = vrot.slane %v1768_v23, %v3492_v45  ;;  %v1791_v7 = vrot.slane %v1769_v8, %v3492_v45  ;;  %v1799_v0 = vcombine.high %v1777_v48, %v1777_v48 }
 0x738   : > { %v1806_v24 = vrot.slane %v1777_v48, %v3438_v4 }
 0x739   : > { %v1798_v35 = vrot.slane %v1770_v44, %v3492_v45  ;;  %v1800_v32 = vcombine.high %v1784_v25, %v1784_v25  ;;  %v1801_v57 = vcombine.high %v1791_v7, %v1791_v7  ;;  %v1810_v12 = vrot.slane %v1791_v7, %v3438_v4 }
 0x73a   : > { %v1814_v9 = vrot.slane %v1799_v0, %v3438_v4  ;;  %v1822_v11 = vrot.slane %v1784_v25, %v3438_v4  ;;  %v1843_v54 = vadd.f32 %v1806_v24, %v3754_v26  ;;  %v2593_v7 = vunpack.c.h.bf16 %v2596_v61 }
 0x73b   : > { %v1802_v33 = vcombine.high %v1798_v35, %v1798_v35  ;;  %v1818_v34 = vrot.slane %v1801_v57, %v3438_v4  ;;  %v1826_v37 = vrot.slane %v1798_v35, %v3438_v4  ;;  %v1830_v31 = vrot.slane %v1800_v32, %v3438_v4 }
 0x73c   : > { %v1859_v45 = vadd.f32 %v2580_v28, %v1843_v54  ;;  %v1844_v50 = vadd.f32 %v1810_v12, %v3754_v26  ;;  %v1845_v55 = vadd.f32 %v1814_v9, %v3754_v26  ;;  %v1847_v59 = vadd.f32 %v1822_v11, %v3754_v26 }
 0x73d   : > { %v1846_v42 = vadd.f32 %v1818_v34, %v3754_v26  ;;  %v1848_v27 = vadd.f32 %v1826_v37, %v3754_v26  ;;  %v1849_v56 = vadd.f32 %v1830_v31, %v3754_v26  ;;  %v1834_v36 = vrot.slane %v1802_v33, %v3438_v4 }
 0x73e   : > { %vm1867_vm1 = vcmp.gt.f32.partialorder %v1859_v45, 0.0  ;;  %v1875_v30 = vmul.f32 0.2, %v1859_v45  ;;  %v1860_v47 = vadd.f32 %v2581_v52, %v1844_v50  ;;  %v1861_v51 = vadd.f32 %v2584_v63, %v1845_v55 }
 0x73f   : > { %v1862_v3 = vadd.f32 %v2585_v14, %v1846_v42  ;;  %v1863_v38 = vadd.f32 %v2588_v2, %v1847_v59  ;;  %v1864_v40 = vadd.f32 %v2589_v60, %v1848_v27  ;;  %v1865_v44 = vadd.f32 %v2592_v22, %v1849_v56 }
 0x740   : > { %v1883_v6 = vsel %vm1867_vm1, %v1859_v45, %v1875_v30  ;;  %vm1868_vm11 = vcmp.gt.f32.partialorder %v1860_v47, 0.0  ;;  %v1876_v23 = vmul.f32 0.2, %v1860_v47  ;;  %vm1869_vm12 = vcmp.gt.f32.partialorder %v1861_v51, 0.0 }
 0x741   : > { %v1897_v8 = vmul.f32 %v2570_v46, %v1883_v6  ;;  %v1877_v48 = vmul.f32 0.2, %v1861_v51  ;;  %vm1870_vm13 = vcmp.gt.f32.partialorder %v1862_v3, 0.0  ;;  %v1878_v49 = vmul.f32 0.2, %v1862_v3 }
 0x742   : > { %v1884_v43 = vsel %vm1868_vm11, %v1860_v47, %v1876_v23  ;;  %v1879_v28 = vmul.f32 0.2, %v1863_v38  ;;  %vm1871_vm14 = vcmp.gt.f32.partialorder %v1863_v38, 0.0  ;;  %v1880_v24 = vmul.f32 0.2, %v1864_v40 }
 0x743   : > { %1905 = vadd.xlane.f32.xlu1 %v1897_v8  ;;  %v1898_v25 = vmul.f32 %v2570_v46, %v1884_v43  ;;  %v1885_v52 = vsel %vm1869_vm12, %v1861_v51, %v1877_v48  ;;  %v1886_v0 = vsel %vm1870_vm13, %v1862_v3, %v1878_v49  ;;  %vm1872_vm15 = vcmp.gt.f32.partialorder %v1864_v40, 0.0 }
 0x744   : > { %v1899_v63 = vmul.f32 %v2570_v46, %v1885_v52  ;;  %v1850_v14 = vadd.f32 %v1834_v36, %v3754_v26  ;;  %v1887_v2 = vsel %vm1871_vm14, %v1863_v38, %v1879_v28  ;;  %v1881_v35 = vmul.f32 0.2, %v1865_v44 }
 0x745   : > { %1907 = vadd.xlane.f32.xlu0 %v1898_v25  ;;  %v1900_v32 = vmul.f32 %v2570_v46, %v1886_v0  ;;  %vm1873_vm0 = vcmp.gt.f32.partialorder %v1865_v44, 0.0  ;;  %v1888_v12 = vsel %vm1872_vm15, %v1864_v40, %v1880_v24  ;;  %v1901_v9 = vmul.f32 %v2570_v46, %v1887_v2 }
 0x746   : > { %v1866_v57 = vadd.f32 %v2593_v7, %v1850_v14  ;;  %v1889_v54 = vsel %vm1873_vm0, %v1865_v44, %v1881_v35  ;;  %v1902_v60 = vmul.f32 %v2570_v46, %v1888_v12  ;;  %vm3064_vm1 = vmmov 0  }
 0x747   : > { %1909 = vadd.xlane.f32.xlu1 %v1899_v63  ;;  %v1903_v33 = vmul.f32 %v2570_v46, %v1889_v54  ;;  %2601 = vmatprep.mubr.msk.bf16.mxu0 %vm3064_vm1, %v3063_v41 }
 0x748   : > { %vm1874_vm2 = vcmp.gt.f32.partialorder %v1866_v57, 0.0  ;;  %v1882_v11 = vmul.f32 0.2, %v1866_v57 }
 0x749   : > { %1911 = vadd.xlane.f32.xlu0 %v1900_v32 }
 0x74a   : > { %v1890_v61 = vsel %vm1874_vm2, %v1866_v57, %v1882_v11 }
 0x74b   : > { %1913 = vadd.xlane.f32.xlu1 %v1901_v9  ;;  %v1904_v34 = vmul.f32 %v2570_v46, %v1890_v61 }
 0x74d   : > { %1915 = vadd.xlane.f32.xlu0 %v1902_v60 }
 0x74f   : > { %1917 = vadd.xlane.f32.xlu1 %v1903_v33 }
 0x751   : > { %1919 = vadd.xlane.f32.xlu0 %v1904_v34 }
 0x7d0   : > { %v1906_v26 = vpop.xlane.xlu1 %1905 }
 0x7d1   : > { %v1921_v37 = vadd.f32 %v1906_v26, %v3631_v15 }
 0x7d2   : > { %v1908_v31 = vpop.xlane.xlu0 %1907 }
 0x7d3   : > { %v1922_v45 = vadd.f32 %v1908_v31, %v3627_v58  ;;  %1938 = vperm.xlu1 %2698, %v1921_v37  }
 0x7d4   : > { %v1910_v50 = vpop.xlane.xlu1 %1909 }
 0x7d5   : > { %v1923_v55 = vadd.f32 %v1910_v50, %v3629_v1  ;;  %1941 = vperm.xlu0 %2697, %v1922_v45  }
 0x7d6   : > { %v1912_v59 = vpop.xlane.xlu0 %1911 }
 0x7d7   : > { %1944 = vperm.xlu1 %2698, %v1923_v55   ;;  %v1924_v46 = vadd.f32 %v1912_v59, %v3633_v17 }
 0x7d8   : > { %v1914_v42 = vpop.xlane.xlu1 %1913 }
 0x7d9   : > { %v1925_v27 = vadd.f32 %v1914_v42, %v3635_v19 }
 0x7da   : > { %v1916_v22 = vpop.xlane.xlu0 %1915 }
 0x7db   : > { %v1926_v56 = vadd.f32 %v1916_v22, %v3637_v29  ;;  %1950 = vperm.xlu1 %2698, %v1925_v27  }
 0x7dc   : > { %v1918_v15 = vpop.xlane.xlu1 %1917 }
 0x7dd   : > { %1953 = vperm.xlu0 %2697, %v1926_v56   ;;  %v1927_v1 = vadd.f32 %v1918_v15, %v3654_v13 }
 0x7de   : > { %v1920_v30 = vpop.xlane.xlu0 %1919 }
 0x7df   : > { %v3795_v58 = vadd.f32 %v1920_v30, %v3659_v21  ;;  %1947 = vperm.xlu1 %2698, %v1924_v46  }
 0x7e1   : > { %1959 = vperm.xlu0 %2697, %v3795_v58  }
 0x7e3   : > { %1956 = vperm.xlu1 %2698, %v1927_v1  }
 0x852   : > { %v1939_v47 = vpop.permute.xlu1 %1938 }
 0x853   : > { %v1964_v17 = vrot.slane %v1939_v47, %v3668_v39 }
 0x854   : > { %v1942_v19 = vpop.permute.xlu0 %1941 }
 0x855   : > { %v1968_v29 = vrot.slane %v1942_v19, %v3668_v39 }
 0x856   : > { %v1945_v51 = vpop.permute.xlu1 %1944 }
 0x857   : > { %v1972_v38 = vrot.slane %v1945_v51, %v3668_v39  ;;  %v1993_v21 = vsel %vm1135_vm3, %v1968_v29, %v1964_v17 }
 0x859   : > { %v1994_v13 = vsel %vm1137_vm4, %v1972_v38, %v1993_v21 }
 0x85a   : > { %v1951_v3 = vpop.permute.xlu1 %1950 }
 0x85b   : > { %v1980_v23 = vrot.slane %v1951_v3, %v3668_v39 }
 0x85c   : > { %v1954_v40 = vpop.permute.xlu0 %1953 }
 0x85d   : > { %v1984_v8 = vrot.slane %v1954_v40, %v3668_v39 }
 0x85e   : > { %v1948_v36 = vpop.permute.xlu1 %1947 }
 0x85f   : > { %v1976_v6 = vrot.slane %v1948_v36, %v3668_v39 }
 0x860   : > { %v1960_v49 = vpop.permute.xlu0 %1959 }
 0x861   : > { %v1995_v48 = vsel %vm1139_vm5, %v1976_v6, %v1994_v13  ;;  %v1992_v52 = vrot.slane %v1960_v49, %v3668_v39 }
 0x862   : > { %v1996_v43 = vsel %vm1141_vm6, %v1980_v23, %v1995_v48  ;;  %v1957_v28 = vpop.permute.xlu1 %1956 }
 0x863   : > { %v1988_v44 = vrot.slane %v1957_v28, %v3668_v39  ;;  %v1997_v25 = vsel %vm1143_vm7, %v1984_v8, %v1996_v43 }
 0x865   : > { %v1998_v7 = vsel %vm1145_vm8, %v1988_v44, %v1997_v25 }
 0x866   : > { %v1999_v0 = vsel %vm1147_vm9, %v1992_v52, %v1998_v7 }
 0x867   : > { %v2001_v24 = vsel %vm1150_vm10, %v1999_v0, -inf }
 0x868   : > { %2002 = vmax.xlane.f32.xlu1 %v2001_v24 }
 0x8f5   : > { %v2003_v63 = vpop.xlane.xlu1 %2002 }
 0x8f6   : > { %v2008_v14 = vrot.slane %v2003_v63, %v3438_v4  ;;  %v2012_v2 = vrot.slane %v2003_v63, %v3441_v5  ;;  %v2016_v35 = vrot.slane %v2003_v63, %v3444_v10  ;;  %v2020_v9 = vrot.slane %v2003_v63, %v3457_v16 }
 0x8f7   : > { %v2024_v60 = vrot.slane %v2003_v63, %v3468_v20  ;;  %v2028_v34 = vrot.slane %v2003_v63, %v3462_v18  ;;  %v2036_v42 = vrot.slane %v2003_v63, %v3618_v53 }
 0x8f8   : > { %v2045_v32 = vsub.f32 %v1921_v37, %v2008_v14  ;;  %v2046_v57 = vsub.f32 %v1922_v45, %v2012_v2  ;;  %v2047_v11 = vsub.f32 %v1923_v55, %v2016_v35  ;;  %v2048_v61 = vsub.f32 %v1924_v46, %v2020_v9 }
 0x8f9   : > { %v2049_v26 = vsub.f32 %v1925_v27, %v2024_v60  ;;  %v2032_v37 = vrot.slane %v2003_v63, %v3621_v62  ;;  %v2050_v45 = vsub.f32 %v1926_v56, %v2028_v34  ;;  %v2052_v27 = vsub.f32 %v3795_v58, %v2036_v42 }
 0x8fa   : > { %v2053_v12 = vmul.f32 1.442695, %v2045_v32  ;;  %v2055_v54 = vmul.f32 1.442695, %v2046_v57  ;;  %v2057_v33 = vmul.f32 1.442695, %v2047_v11 }
 0x8fb   : > { %v2059_v31 = vmul.f32 1.442695, %v2048_v61  ;;  %v2061_v59 = vmul.f32 1.442695, %v2049_v26  ;;  %v2051_v22 = vsub.f32 %v1927_v1, %v2032_v37  ;;  %v2063_v46 = vmul.f32 1.442695, %v2050_v45 }
 0x8fc   : > { %2771 = vpow2.f32 %v2053_v12  ;;  %v2067_v19 = vmul.f32 1.442695, %v2052_v27 }
 0x8fd   : > { %2773 = vpow2.f32 %v2055_v54  ;;  %v2065_v30 = vmul.f32 1.442695, %v2051_v22 }
 0x8fe   : > { %2775 = vpow2.f32 %v2057_v33 }
 0x8ff   : > { %2777 = vpow2.f32 %v2059_v31 }
 0x900   : > { %2779 = vpow2.f32 %v2061_v59 }
 0x901   : > { %2781 = vpow2.f32 %v2063_v46 }
 0x902   : > { %2783 = vpow2.f32 %v2065_v30 }
 0x903   : > { %2785 = vpow2.f32 %v2067_v19 }
 0x906   : > { %v2772_v50 = vpop.eup %2771 }
 0x907   : > { %2078 = vperm.xlu0 %2697, %v2772_v50   ;;  %v2774_v55 = vpop.eup %2773 }
 0x908   : > { %v2776_v15 = vpop.eup %2775 }
 0x909   : > { %v2778_v47 = vpop.eup %2777 }
 0x90a   : > { %v2780_v56 = vpop.eup %2779 }
 0x90b   : > { %2081 = vperm.xlu0 %2697, %v2774_v55   ;;  %v2782_v51 = vpop.eup %2781 }
 0x90c   : > { %v2784_v29 = vpop.eup %2783 }
 0x90d   : > { %v3824_v1 = vpop.eup %2785 }
 0x90f   : > { %2084 = vperm.xlu0 %2697, %v2776_v15  }
 0x913   : > { %2087 = vperm.xlu0 %2697, %v2778_v47  }
 0x917   : > { %2090 = vperm.xlu0 %2697, %v2780_v56  }
 0x91b   : > { %2093 = vperm.xlu0 %2697, %v2782_v51  }
 0x91f   : > { %2096 = vperm.xlu0 %2697, %v2784_v29  }
 0x923   : > { %2099 = vperm.xlu0 %2697, %v3824_v1  }
 0x986   : > { %v2079_v3 = vpop.permute.xlu0 %2078 }
 0x987   : > { %v2104_v13 = vrot.slane %v2079_v3, %v3668_v39 }
 0x98a   : > { %v2082_v17 = vpop.permute.xlu0 %2081 }
 0x98b   : > { %v2108_v36 = vrot.slane %v2082_v17, %v3668_v39 }
 0x98d   : > { %v2133_v49 = vsel %vm1135_vm3, %v2108_v36, %v2104_v13 }
 0x98e   : > { %v2085_v58 = vpop.permute.xlu0 %2084 }
 0x98f   : > { %v2112_v6 = vrot.slane %v2085_v58, %v3668_v39 }
 0x991   : > { %v2134_v28 = vsel %vm1137_vm4, %v2112_v6, %v2133_v49 }
 0x992   : > { %v2088_v38 = vpop.permute.xlu0 %2087 }
 0x993   : > { %v2116_v23 = vrot.slane %v2088_v38, %v3668_v39 }
 0x995   : > { %v2135_v25 = vsel %vm1139_vm5, %v2116_v23, %v2134_v28 }
 0x996   : > { %v2091_v40 = vpop.permute.xlu0 %2090 }
 0x997   : > { %v2120_v8 = vrot.slane %v2091_v40, %v3668_v39 }
 0x999   : > { %v2136_v52 = vsel %vm1141_vm6, %v2120_v8, %v2135_v25 }
 0x99a   : > { %v2094_v21 = vpop.permute.xlu0 %2093 }
 0x99b   : > { %v2124_v43 = vrot.slane %v2094_v21, %v3668_v39 }
 0x99d   : > { %v2137_v0 = vsel %vm1143_vm7, %v2124_v43, %v2136_v52 }
 0x99e   : > { %v2097_v48 = vpop.permute.xlu0 %2096 }
 0x99f   : > { %v2128_v44 = vrot.slane %v2097_v48, %v3668_v39 }
 0x9a1   : > { %v2138_v63 = vsel %vm1145_vm8, %v2128_v44, %v2137_v0  ;;  %v2571_v0 = vld [vmem:[%s3993_s29] ss:$0 sm:$0xff] }
 0x9a2   : > { %v2100_v7 = vpop.permute.xlu0 %2099 }
 0x9a3   : > { %v2132_v24 = vrot.slane %v2100_v7, %v3668_v39 }
 0x9a5   : > { %v2139_v14 = vsel %vm1147_vm9, %v2132_v24, %v2138_v63 }
 0x9a6   : > { %v2141_v2 = vsel %vm1150_vm10, %v2139_v14, 0.0 }
 0x9a7   : > { %2142 = vadd.xlane.f32.xlu0 %v2141_v2 }
 0xa34   : > { %v2143_v35 = vpop.xlane.xlu0 %2142 }
 0xa35   : > { %2787 = vrcp.f32 %v2143_v35 }
 0xa3f   : > { %v2788_v32 = vpop.eup %2787 }
 0xa40   : > { %v2165_v57 = vrot.slane %v2788_v32, %v3468_v20  ;;  %v2149_v12 = vrot.slane %v2788_v32, %v3438_v4  ;;  %v2153_v9 = vrot.slane %v2788_v32, %v3441_v5  ;;  %v2157_v61 = vrot.slane %v2788_v32, %v3444_v10 }
 0xa41   : > { %v2161_v26 = vrot.slane %v2788_v32, %v3457_v16  ;;  %v2169_v5 = vrot.slane %v2788_v32, %v3462_v18  ;;  %v2173_v10 = vrot.slane %v2788_v32, %v3621_v62  ;;  %v2177_v30 = vrot.slane %v2788_v32, %v3618_v53 }
 0xa42   : > { %v2190_v11 = vmul.f32 %v2780_v56, %v2165_v57  ;;  %v2186_v54 = vmul.f32 %v2772_v50, %v2149_v12  ;;  %v2187_v60 = vmul.f32 %v2774_v55, %v2153_v9  ;;  %v2188_v59 = vmul.f32 %v2776_v15, %v2157_v61 }
 0xa43   : > { %v2189_v4 = vmul.f32 %v2778_v47, %v2161_v26  ;;  %v2191_v22 = vmul.f32 %v2782_v51, %v2169_v5  ;;  %v2192_v27 = vmul.f32 %v2784_v29, %v2173_v10  ;;  %v2193_v56 = vmul.f32 %v3824_v1, %v2177_v30 }
 0xa44   : > { %v2198_v33 = vpack.c.bf16 %v2190_v11, %v2190_v11  ;;  %v2194_v34 = vpack.c.bf16 %v2186_v54, %v2186_v54  ;;  %v2195_v45 = vpack.c.bf16 %v2187_v60, %v2187_v60  ;;  %v2196_v42 = vpack.c.bf16 %v2188_v59, %v2188_v59 }
 0xa45   : > { %v2197_v55 = vpack.c.bf16 %v2189_v4, %v2189_v4  ;;  %v2199_v16 = vpack.c.bf16 %v2191_v22, %v2191_v22  ;;  %v2200_v19 = vpack.c.bf16 %v2192_v27, %v2192_v27  ;;  %v2201_v18 = vpack.c.bf16 %v2193_v56, %v2193_v56 }
 0xa46   : > { %v2221_v31 = vunpack.c.l.b16 %v2198_v33  ;;  %v2217_v37 = vunpack.c.l.b16 %v2194_v34  ;;  %v2218_v20 = vunpack.c.l.b16 %v2195_v45  ;;  %v2219_v50 = vunpack.c.l.b16 %v2196_v42 }
 0xa47   : > { %v2220_v46 = vunpack.c.l.b16 %v2197_v55  ;;  %v2222_v15 = vunpack.c.l.b16 %v2199_v16  ;;  %v2223_v47 = vunpack.c.l.b16 %v2200_v19  ;;  %v2224_v3 = vunpack.c.l.b16 %v2201_v18 }
 0xa48   : > { %2238 = vperm.xlu0 %2697, %v2221_v31   ;;  %2226 = vperm.xlu1 %2698, %v2217_v37  }
 0xa4c   : > { %2229 = vperm.xlu1 %2698, %v2218_v20  }
 0xa50   : > { %2232 = vperm.xlu1 %2698, %v2219_v50  }
 0xa54   : > { %2235 = vperm.xlu1 %2698, %v2220_v46  }
 0xa58   : > { %2241 = vperm.xlu1 %2698, %v2222_v15  }
 0xa5c   : > { %2244 = vperm.xlu1 %2698, %v2223_v47  }
 0xa60   : > { %2247 = vperm.xlu1 %2698, %v2224_v3  }
 0xac7   : > { %v2227_v62 = vpop.permute.xlu1 %2226  ;;  %v2239_v21 = vpop.permute.xlu0 %2238 }
 0xac8   : > { %v2252_v1 = vrot.slane %v2227_v62, %v3668_v39  ;;  %v2268_v8 = vrot.slane %v2239_v21, %v3668_v39 }
 0xacb   : > { %v2230_v51 = vpop.permute.xlu1 %2229 }
 0xacc   : > { %v2256_v53 = vrot.slane %v2230_v51, %v3668_v39 }
 0xace   : > { %v2281_v36 = vsel %vm1135_vm3, %v2256_v53, %v2252_v1 }
 0xacf   : > { %v2233_v17 = vpop.permute.xlu1 %2232 }
 0xad0   : > { %v2260_v58 = vrot.slane %v2233_v17, %v3668_v39 }
 0xad2   : > { %v2282_v6 = vsel %vm1137_vm4, %v2260_v58, %v2281_v36 }
 0xad3   : > { %v2236_v29 = vpop.permute.xlu1 %2235 }
 0xad4   : > { %v2264_v40 = vrot.slane %v2236_v29, %v3668_v39 }
 0xad6   : > { %v2283_v41 = vsel %vm1139_vm5, %v2264_v40, %v2282_v6 }
 0xad7   : > { %v2242_v38 = vpop.permute.xlu1 %2241  ;;  %v2284_v49 = vsel %vm1141_vm6, %v2268_v8, %v2283_v41 }
 0xad8   : > { %v2272_v23 = vrot.slane %v2242_v38, %v3668_v39 }
 0xada   : > { %v2285_v28 = vsel %vm1143_vm7, %v2272_v23, %v2284_v49 }
 0xadb   : > { %v2245_v13 = vpop.permute.xlu1 %2244 }
 0xadc   : > { %v2276_v48 = vrot.slane %v2245_v13, %v3668_v39 }
 0xade   : > { %v2286_v25 = vsel %vm1145_vm8, %v2276_v48, %v2285_v28 }
 0xadf   : > { %v2248_v43 = vpop.permute.xlu1 %2247 }
 0xae0   : > { %v2280_v44 = vrot.slane %v2248_v43, %v3668_v39 }
 0xae2   : > { %v2287_v52 = vsel %vm1147_vm9, %v2280_v44, %v2286_v25 }
 0xae3   : > { %v2288_v7 = vpack.c.b16 %v2287_v52, %v2287_v52 }
 0xae5   : > { %2602 = vmatmul.mubr.msk.bf16.vlgmr.msra.gmra.mrb[12].mxu0 %vm1150_vm10, %v2288_v7 }
 0xbb8   : > { %v2329_v24 = vpop.f32.mrb[12].mxu0 }
 0xbb9   : > { %v2330_v63 = vadd.f32 %v2571_v0, %v2329_v24  ;;  %v2603_v14 = vpop.f32.mrb[13].mxu0 }
 0xbba   : > { %v2332_v2 = vpop.f32.mrb[14].mxu0 }
 0xbbb   : > { %v2335_v35 = vrot.slane %v2330_v63, 4  ;;  %v2604_v39 = vpop.f32.mrb[15].mxu0 }
 0xbbd   : > { %v2336_v32 = vadd.f32 %v2335_v35, %v2330_v63 }
 0xbbf   : > { %v2337_v57 = vrot.slane %v2336_v32, 2 }
 0xbc1   : > { %v2338_v12 = vadd.f32 %v2337_v57, %v2336_v32 }
 0xbc3   : > { %v2339_v9 = vrot.slane %v2338_v12, 1 }
 0xbc5   : > { %v2340_v11 = vadd.f32 %v2339_v9, %v2338_v12 }
 0xbc7   : > { %v2342_v54 = vmul.f32 0.125, %v2340_v11 }
 0xbc9   : > { %2343 = vst [vmem:[%s570_s15] sm:$0x1] %v2342_v54 }
 0xbca   : > { %2978 = shalt.err (!%p2975_p10)
}
 0xbcb   : > { %s2979_s12 = scalar_lea.hbm %s3877_s23, 16  ;;  %s2983_s14 = scalar_lea.hbm %s3995_s20, 64 }
 0xbcc   : > { %p2980_p5 = scmp.ne.s32.totalorder %s3877_s23, %s2979_s12  ;;  %p2984_p0 = scmp.lt.u32.totalorder %s3877_s23, %s3995_s20 }
 0xbcd   : > { %p2985_p12 = scmp.lt.u32.totalorder %s2983_s14, %s2979_s12  ;;  %p2987_p13 = scmp.lt.u32.totalorder %s2979_s12, %s3877_s23 }
 0xbce   : > { %p2981_p1 = pnand %p2980_p5, %p3996_p6 }
 0xbcf   : > { %p2986_p4 = por %p2985_p12, %p2984_p0 }
 0xbd0   : > { %p2982_p9 = pneg %p2981_p1 }
 0xbd1   : > { %p2988_p11 = por %p2987_p13, %p2986_p4 }
 0xbd3   : > { %p2989_p3 = pnand %p2988_p11, %p2982_p9 }
 0xbd5   : > { %2992 = shalt.err (!%p2989_p3)
}
 0xbd6   : > { %2621 = dma.vmem_to_hbm [thread:$0]  (%p3996_p6), %s3879_s26, 16, %s3877_s23, %s2345_s30  }
 0xbd7 PF: > { %s3997_s13 = sld [smem:[#allocation20_spill]]  ;;  %s3998_s11 = sld [smem:[#allocation22_spill]] }
 0xbd8   : > { %p2652_p8 = scmp.ge.s32.totalorder %s3047_s24, 2 }
 0xbdd   : > { %s2369_s29 = sand.u32 1, %s3997_s13   ;;  %p3999_p7 = scmp.ne.s32.totalorder %s3998_s11, 0 }
 0xbde   : > { %s2370_s9 = scalar_lea.sflag [#allocation4], %s2369_s29 }
 0xbdf   : > { %p2644_p2 = pnand %p2652_p8, %p3999_p7 }
 0xbe1   : > { %3030 = dma.done.wait (!%p2644_p2), %s2370_s9, 16  }
 0xbe2   : > { %3032 = vsyncadd (!%p2644_p2), %s2370_s9, 4294967280  ;;  %s4000_s24 = sld [smem:[#allocation23_spill]]  ;;  %s4001_s15 = sld [smem:[#allocation21_spill]] }
 0xbe3   : > { %s4002_s23 = sld [smem:[#allocation24_spill]]  ;;  %s4003_s21 = smov %s3039_s22 }
 0xbe8   : > { %p32_p10 = scmp.ge.s32.totalorder %s4000_s24, 6   ;;  %s4004_s22 = smov %s4001_s15 }
 0xbea   :  { %34 = sbr.rel (!%p32_p10) target bundleno = 17 (0x11), region = 158 }
 0xbf1   :  { %2374 = vsyncpa [#allocation3], 1 }
 0xbf2   :  { %2376 = vsyncpa [#allocation3 + $0x1], 1 }
 0xbf3   :  { %2377 = vsyncpa [#allocation6], 1 }
 0xbf4   :  { %2379 = vsyncpa [#allocation6 + $0x1], 1 }
 0xbf5   :  { %2380 = vsyncpa [#allocation9], 1 }
 0xbf6   :  { %2382 = vsyncpa [#allocation9 + $0x1], 1 }
 0xbf7   :  { %2383 = vsyncpa [#allocation12], 1 }
 0xbf8   :  { %2384 = vsyncpa [#allocation4], 1 }
 0xbf9   :  { %2386 = vsyncpa [#allocation4 + $0x1], 1 }

</bundles_post_ra>
